<compile_context>
chip_gen: v6e
topology: v6e:2x2x1
jax: 0.10.0
libtpu: 0.0.40
codegen_flags: <defaults>
</compile_context>

<pallas_src>
import jax
import jax.numpy as jnp
from jax import lax
from jax.experimental import pallas as pl
from jax.experimental.pallas import tpu as pltpu


# ----------------------------- Pallas kernel --------------------------------

def _up2x_conv_kernel(x_ref, w_ref, b_ref, o_ref):
    """Fused 3x3 valid conv + bias + ReLU over one padded row-tile of one image.

    x_ref: (Cin, TH+2, Wp)   bf16  upsampled+reflection-padded activation (halo rows)
    w_ref: (Cout, 9*Cin)     bf16  conv weights flattened as [(kh*3+kw)*Cin + c]
    b_ref: (Cout, 1)         f32
    o_ref: (Cout, TH*W2)     out dtype, flattened lane-dense output tile
    """
    cin, thp2, wp = x_ref.shape
    th, w2 = thp2 - 2, wp - 2

    # In-kernel im2col: 9 shifted windows stacked along the contraction axis.
    taps = [x_ref[:, kh:kh + th, kw:kw + w2]          # (Cin, TH, W2) each
            for kh in range(3) for kw in range(3)]
    patches = jnp.concatenate(taps, axis=0)           # (9*Cin, TH, W2)
    patches = patches.reshape(9 * cin, th * w2)       # (K, M) — minor-dims collapse

    # Single MXU matmul with f32 accumulation.
    acc = jnp.dot(w_ref[...], patches,
                  preferred_element_type=jnp.float32)  # (Cout, TH*W2)

    y = jnp.maximum(acc + b_ref[...], 0.0)             # bias + ReLU in f32
    o_ref[...] = y.astype(o_ref.dtype)                 # one contiguous lane-dense store


# --------------------------- wrapper-side helpers ----------------------------

def _pick_tile_h(H2, W2, cin, cout, budget_bytes=24 << 20):
    """Largest row-tile whose per-step VMEM (double-buffered I/O + im2col scratch)
    fits the budget.  Tiles of th < H2 must keep the output block lane-dense
    (th * W2 multiple of 128); th == H2 (full height) is always legal."""
    wp = W2 + 2

    def step_bytes(th):
        in_blk = cin * (th + 2) * wp * 2          # bf16 halo tile
        out_blk = cout * th * W2 * 4              # f32 output tile
        scratch = 9 * cin * th * W2 * 2 * 2       # patches + slice temporaries (bf16)
        scratch += cout * th * W2 * 4             # f32 accumulator
        return 2 * in_blk + 2 * out_blk + scratch

    cands = [th for th in range(8, H2, 8)
             if H2 % th == 0 and (th * W2) % 128 == 0]
    cands.append(H2)                              # full-height tile always allowed
    fitting = [th for th in cands if step_bytes(th) <= budget_bytes]
    return max(fitting) if fitting else min(cands)


def _bilinear_src_idx(out_size, in_size):
    """align_corners=False source indices/weights (matches nn.Upsample bilinear)."""
    d = jnp.arange(out_size, dtype=jnp.float32)
    src = (d + 0.5) * (in_size / out_size) - 0.5
    src = jnp.maximum(src, 0.0)                   # PyTorch clamps negative src
    i0 = jnp.minimum(jnp.floor(src).astype(jnp.int32), in_size - 1)
    i1 = jnp.minimum(i0 + 1, in_size - 1)
    lam = src - i0.astype(jnp.float32)
    return i0, i1, lam


def _reflect1(idx, size):
    """ReflectionPad2d(1) index map for positions idx in [-1, size]."""
    j = jnp.where(idx < 0, -idx, idx)
    return jnp.where(j > size - 1, 2 * (size - 1) - j, j)


def _build_padded_tiles(x, tile_h, compute_dtype):
    """Fused bilinear-2x upsample + ReflectionPad2d(1) + overlapping H-halo tiling
    as a single XLA gather.  x: (N, Cin, H, W) f32
    -> (N, n_t, Cin, tile_h + 2, Wp) compute_dtype, Wp = 2W + 2.
    Minor dims are spatial (TH+2, Wp) so bf16 sublanes are not wasted on Cin."""
    N, Cin, H, W = x.shape
    H2, W2 = 2 * H, 2 * W
    Hp, Wp = H2 + 2, W2 + 2
    n_t = H2 // tile_h

    h0, h1, lh = _bilinear_src_idx(H2, H)
    w0, w1, lw = _bilinear_src_idx(W2, W)

    # padded coordinate -> reflected upsampled coordinate
    hrefl = _reflect1(jnp.arange(Hp, dtype=jnp.int32) - 1, H2)    # (Hp,)
    wrefl = _reflect1(jnp.arange(Wp, dtype=jnp.int32) - 1, W2)    # (Wp,)

    # padded rows needed by tile t: [t*tile_h, t*tile_h + tile_h + 2)
    rows = (jnp.arange(n_t, dtype=jnp.int32)[:, None] * tile_h
            + jnp.arange(tile_h + 2, dtype=jnp.int32)[None, :]).reshape(-1)
    rows = hrefl[rows]                                            # (n_t*(tile_h+2),)

    h0r, h1r, lhr = h0[rows], h1[rows], lh[rows]
    w0c, w1c, lwc = w0[wrefl], w1[wrefl], lw[wrefl]

    t = (x[:, :, h0r, :] * (1.0 - lhr)[None, None, :, None]
         + x[:, :, h1r, :] * lhr[None, None, :, None])            # (N, Cin, L, W)
    y = (t[:, :, :, w0c] * (1.0 - lwc)[None, None, None, :]
         + t[:, :, :, w1c] * lwc[None, None, None, :])            # (N, Cin, L, Wp)

    y = y.reshape(N, Cin, n_t, tile_h + 2, Wp)
    y = jnp.transpose(y, (0, 2, 1, 3, 4))                         # (N, n_t, Cin, TH+2, Wp)
    return y.astype(compute_dtype)


def up2x_forward(x, weight, bias, *, tile_h=None, compute_dtype=jnp.bfloat16,
                 out_dtype=jnp.float32):
    """x: (N, Cin, H, W) f32; weight: (Cout, Cin, 3, 3); bias: (Cout,)
    -> (N, Cout, 2H, 2W) out_dtype (same semantics as PyTorch Up2x.forward)."""
    N, Cin, H, W = x.shape
    Cout = weight.shape[0]
    H2, W2 = 2 * H, 2 * W
    Wp = W2 + 2
    if tile_h is None:
        tile_h = _pick_tile_h(H2, W2, Cin, Cout)
    assert H2 % tile_h == 0, (H2, tile_h)
    n_t = H2 // tile_h

    x_tiles = _build_padded_tiles(x, tile_h, compute_dtype)       # (N, n_t, Cin, TH+2, Wp)
    # Weights flattened to match the in-kernel concat order: K = (kh*3+kw)*Cin + c.
    w_k = jnp.transpose(weight, (0, 2, 3, 1)).reshape(Cout, 9 * Cin).astype(compute_dtype)
    b_k = bias.astype(jnp.float32).reshape(Cout, 1)

    in_item = jnp.dtype(compute_dtype).itemsize
    out_item = jnp.dtype(out_dtype).itemsize
    cost = pl.CostEstimate(
        flops=2 * N * H2 * W2 * 9 * Cin * Cout,
        transcendentals=0,
        bytes_accessed=(N * n_t * Cin * (tile_h + 2) * Wp * in_item
                        + Cout * 9 * Cin * in_item + Cout * 4
                        + N * Cout * H2 * W2 * out_item),
    )

    out_flat = pl.pallas_call(
        _up2x_conv_kernel,
        out_shape=jax.ShapeDtypeStruct((N, Cout, H2 * W2), out_dtype),
        grid_spec=pltpu.PrefetchScalarGridSpec(
            num_scalar_prefetch=0,
            grid=(N, n_t),
            in_specs=[
                # halo row-tile of the fused padded activation (minor dims spatial)
                pl.BlockSpec((None, None, Cin, tile_h + 2, Wp),
                             lambda n, t: (n, t, 0, 0, 0)),
                # flattened 3x3 weights, resident in VMEM across grid steps
                pl.BlockSpec((Cout, 9 * Cin), lambda n, t: (0, 0)),
                # bias
                pl.BlockSpec((Cout, 1), lambda n, t: (0, 0)),
            ],
            # flattened, lane-dense output tile (single unmasked store per step)
            out_specs=pl.BlockSpec((None, Cout, tile_h * W2),
                                   lambda n, t: (n, 0, t)),
        ),
        compiler_params=pltpu.CompilerParams(
            dimension_semantics=("parallel", "parallel"),
            vmem_limit_bytes=48 * 1024 * 1024),
        cost_estimate=cost,
    )(x_tiles, w_k, b_k)

    return out_flat.reshape(N, Cout, H2, W2)                      # free reshape


# ------------------------------- demo / check --------------------------------

def _reference_forward(x, weight, bias, compute_dtype=jnp.bfloat16):
    """Independent XLA reference (same bf16 input/weight rounding as the kernel)."""
    N, Cin, H, W = x.shape
    h0, h1, lh = _bilinear_src_idx(2 * H, H)
    w0, w1, lw = _bilinear_src_idx(2 * W, W)
    t = (x[:, :, h0, :] * (1.0 - lh)[None, None, :, None]
         + x[:, :, h1, :] * lh[None, None, :, None])
    up = (t[:, :, :, w0] * (1.0 - lw)[None, None, None, :]
          + t[:, :, :, w1] * lw[None, None, None, :])
    xp = jnp.pad(up, ((0, 0), (0, 0), (1, 1), (1, 1)), mode="reflect")
    xp = xp.astype(compute_dtype).astype(jnp.float32)
    wq = weight.astype(compute_dtype).astype(jnp.float32)
    y = lax.conv_general_dilated(
        xp, wq, window_strides=(1, 1), padding="VALID",
        dimension_numbers=("NCHW", "OIHW", "NCHW"),
        precision=lax.Precision.HIGHEST)
    return jnp.maximum(y + bias[None, :, None, None], 0.0)


if __name__ == "__main__":
    key = jax.random.PRNGKey(0)
    kx, kw_, kb = jax.random.split(key, 3)

    N, Cin, H, W = 2, 4, 16, 16
    Cout = 8

    x = jax.random.normal(kx, (N, Cin, H, W), dtype=jnp.float32)
    weight = jax.random.normal(kw_, (Cout, Cin, 3, 3), dtype=jnp.float32) * 0.1
    bias = jax.random.normal(kb, (Cout,), dtype=jnp.float32) * 0.1

    fwd = jax.jit(lambda a, b, c: up2x_forward(a, b, c))
    out = jax.block_until_ready(fwd(x, weight, bias))

    assert out.shape == (N, Cout, 2 * H, 2 * W), out.shape

    ref = _reference_forward(x, weight, bias)
    max_err = float(jnp.max(jnp.abs(out - ref)))
    assert jnp.allclose(out, ref, atol=1e-2, rtol=1e-2), f"max abs err {max_err}"

    print("KERNEL_OK")
</pallas_src>

<mosaic_0001>
module attributes {stable_mosaic.version = 11 : i64} {
  func.func @_up2x_conv_kernel(%arg0: i32, %arg1: i32, %arg2: memref<1x1x4x34x34xbf16, #tpu.memory_space<vmem>>, %arg3: memref<8x36xbf16, #tpu.memory_space<vmem>>, %arg4: memref<8x1xf32, #tpu.memory_space<vmem>>, %arg5: memref<1x8x1024xf32, #tpu.memory_space<vmem>>) attributes {dimension_semantics = [#tpu.dimension_semantics<parallel>, #tpu.dimension_semantics<parallel>], iteration_bounds = array<i64: 2, 1>, scalar_prefetch = 0 : i64, scratch_operands = 0 : i64, tpu.core_type = #tpu.core_type<tc>, window_params = [{transform_indices = @transform_0, window_bounds = array<i64: 1, 1, 4, 34, 34>}, {pipeline_mode = #tpu.pipeline_mode<synchronous>, transform_indices = @transform_1, window_bounds = array<i64: 8, 36>}, {pipeline_mode = #tpu.pipeline_mode<synchronous>, transform_indices = @transform_2, window_bounds = array<i64: 8, 1>}, {transform_indices = @transform_3, window_bounds = array<i64: 1, 8, 1024>}]} {
    %c0 = arith.constant 0 : index
    %c0_0 = arith.constant 0 : index
    %c0_1 = arith.constant 0 : index
    %c0_2 = arith.constant 0 : index
    %c0_3 = arith.constant 0 : index
    %0 = vector.load %arg2[%c0, %c0_0, %c0_1, %c0_2, %c0_3] : memref<1x1x4x34x34xbf16, #tpu.memory_space<vmem>>, vector<1x1x4x32x32xbf16>
    %1 = vector.shape_cast %0 : vector<1x1x4x32x32xbf16> to vector<4x32x32xbf16>
    %c0_4 = arith.constant 0 : index
    %c0_5 = arith.constant 0 : index
    %c0_6 = arith.constant 0 : index
    %c0_7 = arith.constant 0 : index
    %c1 = arith.constant 1 : index
    %2 = vector.load %arg2[%c0_4, %c0_5, %c0_6, %c0_7, %c1] : memref<1x1x4x34x34xbf16, #tpu.memory_space<vmem>>, vector<1x1x4x32x32xbf16>
    %3 = vector.shape_cast %2 : vector<1x1x4x32x32xbf16> to vector<4x32x32xbf16>
    %c0_8 = arith.constant 0 : index
    %c0_9 = arith.constant 0 : index
    %c0_10 = arith.constant 0 : index
    %c0_11 = arith.constant 0 : index
    %c2 = arith.constant 2 : index
    %4 = vector.load %arg2[%c0_8, %c0_9, %c0_10, %c0_11, %c2] : memref<1x1x4x34x34xbf16, #tpu.memory_space<vmem>>, vector<1x1x4x32x32xbf16>
    %5 = vector.shape_cast %4 : vector<1x1x4x32x32xbf16> to vector<4x32x32xbf16>
    %c0_12 = arith.constant 0 : index
    %c0_13 = arith.constant 0 : index
    %c0_14 = arith.constant 0 : index
    %c1_15 = arith.constant 1 : index
    %c0_16 = arith.constant 0 : index
    %6 = vector.load %arg2[%c0_12, %c0_13, %c0_14, %c1_15, %c0_16] : memref<1x1x4x34x34xbf16, #tpu.memory_space<vmem>>, vector<1x1x4x32x32xbf16>
    %7 = vector.shape_cast %6 : vector<1x1x4x32x32xbf16> to vector<4x32x32xbf16>
    %c0_17 = arith.constant 0 : index
    %c0_18 = arith.constant 0 : index
    %c0_19 = arith.constant 0 : index
    %c1_20 = arith.constant 1 : index
    %c1_21 = arith.constant 1 : index
    %8 = vector.load %arg2[%c0_17, %c0_18, %c0_19, %c1_20, %c1_21] : memref<1x1x4x34x34xbf16, #tpu.memory_space<vmem>>, vector<1x1x4x32x32xbf16>
    %9 = vector.shape_cast %8 : vector<1x1x4x32x32xbf16> to vector<4x32x32xbf16>
    %c0_22 = arith.constant 0 : index
    %c0_23 = arith.constant 0 : index
    %c0_24 = arith.constant 0 : index
    %c1_25 = arith.constant 1 : index
    %c2_26 = arith.constant 2 : index
    %10 = vector.load %arg2[%c0_22, %c0_23, %c0_24, %c1_25, %c2_26] : memref<1x1x4x34x34xbf16, #tpu.memory_space<vmem>>, vector<1x1x4x32x32xbf16>
    %11 = vector.shape_cast %10 : vector<1x1x4x32x32xbf16> to vector<4x32x32xbf16>
    %c0_27 = arith.constant 0 : index
    %c0_28 = arith.constant 0 : index
    %c0_29 = arith.constant 0 : index
    %c2_30 = arith.constant 2 : index
    %c0_31 = arith.constant 0 : index
    %12 = vector.load %arg2[%c0_27, %c0_28, %c0_29, %c2_30, %c0_31] : memref<1x1x4x34x34xbf16, #tpu.memory_space<vmem>>, vector<1x1x4x32x32xbf16>
    %13 = vector.shape_cast %12 : vector<1x1x4x32x32xbf16> to vector<4x32x32xbf16>
    %c0_32 = arith.constant 0 : index
    %c0_33 = arith.constant 0 : index
    %c0_34 = arith.constant 0 : index
    %c2_35 = arith.constant 2 : index
    %c1_36 = arith.constant 1 : index
    %14 = vector.load %arg2[%c0_32, %c0_33, %c0_34, %c2_35, %c1_36] : memref<1x1x4x34x34xbf16, #tpu.memory_space<vmem>>, vector<1x1x4x32x32xbf16>
    %15 = vector.shape_cast %14 : vector<1x1x4x32x32xbf16> to vector<4x32x32xbf16>
    %c0_37 = arith.constant 0 : index
    %c0_38 = arith.constant 0 : index
    %c0_39 = arith.constant 0 : index
    %c2_40 = arith.constant 2 : index
    %c2_41 = arith.constant 2 : index
    %16 = vector.load %arg2[%c0_37, %c0_38, %c0_39, %c2_40, %c2_41] : memref<1x1x4x34x34xbf16, #tpu.memory_space<vmem>>, vector<1x1x4x32x32xbf16>
    %17 = vector.shape_cast %16 : vector<1x1x4x32x32xbf16> to vector<4x32x32xbf16>
    %18 = tpu.concatenate %1, %3, %5, %7, %9, %11, %13, %15, %17 in 0 : vector<4x32x32xbf16>, vector<4x32x32xbf16>, vector<4x32x32xbf16>, vector<4x32x32xbf16>, vector<4x32x32xbf16>, vector<4x32x32xbf16>, vector<4x32x32xbf16>, vector<4x32x32xbf16>, vector<4x32x32xbf16> -> vector<36x32x32xbf16>
    %19 = vector.shape_cast %18 : vector<36x32x32xbf16> to vector<36x1024xbf16>
    %c0_42 = arith.constant 0 : index
    %c0_43 = arith.constant 0 : index
    %20 = vector.load %arg3[%c0_42, %c0_43] : memref<8x36xbf16, #tpu.memory_space<vmem>>, vector<8x36xbf16>
    %cst = arith.constant dense<0.000000e+00> : vector<8x1024xf32>
    %21 = tpu.matmul %20, %19, %cst {dimension_numbers = #tpu.dot_dimension_numbers<[1], [0], [0], [1], [0, 0, 1, 1], [], []>} : vector<8x36xbf16>, vector<36x1024xbf16>, vector<8x1024xf32> -> vector<8x1024xf32>
    %c0_44 = arith.constant 0 : index
    %c0_45 = arith.constant 0 : index
    %22 = vector.load %arg4[%c0_44, %c0_45] : memref<8x1xf32, #tpu.memory_space<vmem>>, vector<8x1xf32>
    %23 = vector.broadcast %22 : vector<8x1xf32> to vector<8x1024xf32>
    %24 = arith.addf %21, %23 : vector<8x1024xf32>
    %cst_46 = arith.constant 0.000000e+00 : f32
    %25 = vector.broadcast %cst_46 : f32 to vector<8x1024xf32>
    %26 = arith.maximumf %24, %25 : vector<8x1024xf32>
    %c0_47 = arith.constant 0 : index
    %c0_48 = arith.constant 0 : index
    %c0_49 = arith.constant 0 : index
    %27 = vector.load %arg5[%c0_47, %c0_48, %c0_49] : memref<1x8x1024xf32, #tpu.memory_space<vmem>>, vector<1x8x1024xf32>
    %28 = vector.shape_cast %27 : vector<1x8x1024xf32> to vector<8x1024xf32>
    %29 = vector.shape_cast %26 : vector<8x1024xf32> to vector<1x8x1024xf32>
    tpu.vector_store %arg5[%c0_47, %c0_48, %c0_49], %29 {strides = array<i32>} : memref<1x8x1024xf32, #tpu.memory_space<vmem>>, vector<1x8x1024xf32>,
    return
  }
  func.func @transform_0(%arg0: i32, %arg1: i32) -> (i32, i32, i32, i32, i32) {
    %c0_i32 = arith.constant 0 : i32
    %c0_i32_0 = arith.constant 0 : i32
    %c0_i32_1 = arith.constant 0 : i32
    %c0_i32_2 = arith.constant 0 : i32
    return %arg0, %arg1, %c0_i32, %c0_i32_0, %c0_i32_1 : i32, i32, i32, i32, i32
  }
  func.func @transform_1(%arg0: i32, %arg1: i32) -> (i32, i32) {
    %c0_i32 = arith.constant 0 : i32
    %c0_i32_0 = arith.constant 0 : i32
    %c0_i32_1 = arith.constant 0 : i32
    return %c0_i32, %c0_i32_0 : i32, i32
  }
  func.func @transform_2(%arg0: i32, %arg1: i32) -> (i32, i32) {
    %c0_i32 = arith.constant 0 : i32
    %c0_i32_0 = arith.constant 0 : i32
    %c0_i32_1 = arith.constant 0 : i32
    return %c0_i32, %c0_i32_0 : i32, i32
  }
  func.func @transform_3(%arg0: i32, %arg1: i32) -> (i32, i32, i32) {
    %c0_i32 = arith.constant 0 : i32
    %c0_i32_0 = arith.constant 0 : i32
    return %arg0, %c0_i32, %arg1 : i32, i32, i32
  }
}

</mosaic_0001>

<bundles_post_ra>
// kernel: _lambda_.1
= control target key start
LH: loop header
LB: loop body
LE: loop exit
PB: predicated region body
PF: predicated region fallthrough
CT: control target
= control target key end

     0   :  { %s3877_s12 = smov 0   ;;  %s3879_s13 = smov 0   ;;  %s5978_s0 = inlined_call_operand.vmem [shape: bf16[2,1,4,34,34], index: 0, kind: input, shape index: {}]   ;;  %s5979_s1 = inlined_call_operand.vmem [shape: bf16[8,36], index: 1, kind: input, shape index: {}]   ;;  %s5980_s2 = inlined_call_operand.vmem [shape: f32[8,1], index: 2, kind: input, shape index: {}]   ;;  %s5981_s3 = inlined_call_operand.vmem [shape: f32[2,8,1024], index: 3, kind: output, shape index: {}]  }
   0x1   :  { %s3881_s14 = smov 0  }
   0x2 LB: > { %s25_s15 = sadd.s32 1, %s3843_s13  ;;  %p3620_p0 = scmp.ge.s32.totalorder %s3847_s14, 1  ;;  %s3847_s14 = sphi %s3881_s14, %s13_s14   ;;  %s3843_s13 = sphi %s3879_s13, %s6426_s13   ;;  %s3839_s12 = sphi %s3877_s12, %s6425_s12  }
   0x3   : > { %p27_p1 = scmp.ge.s32.totalorder %s25_s15, 2  ;;  %p157_p2 = scmp.lt.s32.totalorder %s3847_s14, 3 }
   0x5   : > { %s6428_s15 = smov (%p27_p1, %s25_s15), 0  ;;  %p158_p3 = pnand %p3620_p0, %p157_p2 }
   0x7   : > { %161 = sbr.rel (%p158_p3) target bundleno = 686 (0x2ae), region = 32 }
   0xc   : > { %p189_p4 = scmp.lt.s32.totalorder %s3839_s12, 1  ;;  %vm564_vm0 = vcmask 1042432   ;;  %vm565_vm1 = vcmask 1046532   ;;  %s3849_s20 = smov 126   ;;  %vm313_vm3 = vsmask.f32 3328 }
   0xd   : > { %vm3903_vm2 = vmor %vm564_vm0, %vm565_vm1  ;;  %vm314_vm4 = vsmask.f32 7440  ;;  %s3850_s21 = smov 127   ;;  %s3853_s22 = smov 32   ;;  %vm3131_vm6 = vcmask 261120   ;;  %vm3141_vm7 = vcmask 523264  }
   0xe   : > { %s6430_s12 = smov (!%p189_p4, %s3839_s12), 1  ;;  %vm4010_vm5 = vmor %vm313_vm3, %vm314_vm4  ;;  %s3854_s23 = smov 64   ;;  %vm3148_vm8 = vcmask 785408   ;;  %vm3329_vm9 = vcmask 1041408   ;;  %vm3325_vm10 = vcmask 293888  }
   0xf   : > { %s3783_s16 = smul.u32 80, %s6430_s12  ;;  %s3855_s24 = smov 96  }
  0x10   : > { %s3734_s29 = sshll.u32 %s6430_s12, 6 }
  0x11   : > { %s3901_s19 = scalar_lea.vmem %s5978_s0, %s3783_s16  ;;  %s5959_s5 = scalar_lea.vmem %s5981_s3, %s3734_s29 }
  0x12   : > { %v3908_v1 = vld [vmem:[%s3901_s19 + $0x18] sm:$0xf]  ;;  %v230_v2 = vld [vmem:[%s3901_s19 + $0x14] sm:$0xe]  ;;  %v3912_v3 = vld [vmem:[%s3901_s19 + $0x4] sm:$0xf] }
  0x13   : > { %6118 = vst [vmem:[#allocation2_spill] sm:$0xff] %v3908_v1  ;;  %6119 = vst [vmem:[#allocation3_spill] sm:$0xff] %v3912_v3  ;;  %v3625_v4 = vrot.slane %v230_v2, 9  ;;  %v582_v5 = vrot.slane %v3908_v1, 5  ;;  %v229_v6 = vld [vmem:[%s3901_s19] sm:$0xe] }
  0x14   : > { %v569_v7 = vrot.slane %v3912_v3, 5  ;;  %v3624_v8 = vrot.slane %v229_v6, 9  ;;  %v3918_v9 = vld [vmem:[%s3901_s19 + $0x1c] sm:$0xf]  ;;  %v3921_v10 = vld [vmem:[%s3901_s19 + $0x2c] sm:$0xf] }
  0x15   : > { %6120 = vst [vmem:[#allocation4_spill] sm:$0xff] %v3918_v9  ;;  %6121 = vst [vmem:[#allocation5_spill] sm:$0xff] %v3921_v10  ;;  %v3925_v11 = vsel %vm3903_vm2, %v3625_v4, %v582_v5  ;;  %v584_v12 = vrot.slane %v582_v5, 4  ;;  %v585_v13 = vrot.slane %v3918_v9, 5  ;;  %v231_v14 = vld [vmem:[%s3901_s19 + $0x28] sm:$0xe] }
  0x16   : > { %v595_v15 = vrot.slane %v3921_v10, 5  ;;  %659 = vrot.lane.b32.xlu1 %v3925_v11, %s3849_s20  ;;  %v3934_v16 = vsel %vm3903_vm2, %v3624_v8, %v569_v7  ;;  %v3626_v17 = vrot.slane %v231_v14, 9  ;;  %v3937_v18 = vld [vmem:[%s3901_s19 + $0x30] sm:$0xf]  ;;  %v3940_v19 = vld [vmem:[%s3901_s19 + $0x40] sm:$0xf] }
  0x17   : > { %6122 = vst [vmem:[#allocation6_spill] sm:$0xff] %v3940_v19  ;;  %v326_v20 = vshll.u32 %v3912_v3, 16  ;;  %651 = vrot.lane.b32.xlu0 %v3934_v16, %s3849_s20  ;;  %v3949_v21 = vsel %vm3903_vm2, %v584_v12, %v585_v13  ;;  %v598_v23 = vrot.slane %v3937_v18, 5  ;;  %v232_v24 = vld [vmem:[%s3901_s19 + $0x3c] sm:$0xe]  ;;  %v5990_v25 = vshrl.u32 %v3912_v3, 16 }
  0x18   : > { %v597_v22 = vrot.slane %v595_v15, 4  ;;  %v3956_v26 = vsel %vm3903_vm2, %v3626_v17, %v595_v15  ;;  %v3627_v27 = vrot.slane %v232_v24, 9  ;;  %v608_v28 = vrot.slane %v3940_v19, 5  ;;  %v3960_v29 = vld [vmem:[%s3901_s19 + $0x44] sm:$0xf] }
  0x19   : > { %6123 = vst [vmem:[#allocation7_spill] sm:$0xff] %v3960_v29  ;;  %v611_v30 = vrot.slane %v3960_v29, 5  ;;  %v3964_v31 = vld [vmem:[%s3901_s19 + $0x8] sm:$0xf]  ;;  %v571_v32 = vrot.slane %v569_v7, 4  ;;  %v328_v37 = vrot.slane %v326_v20, 5 }
  0x1a   : > { %6124 = vst [vmem:[#allocation8_spill] sm:$0xff] %v3964_v31  ;;  %661 = vrot.lane.b32.xlu1 %v3949_v21, %s3849_s20  ;;  %v610_v33 = vrot.slane %v608_v28, 4  ;;  %v572_v34 = vrot.slane %v3964_v31, 5  ;;  %v3970_v35 = vld [vmem:[%s3901_s19] sm:$0xf]  ;;  %v3978_v36 = vsel %vm3903_vm2, %v597_v22, %v598_v23  ;;  %v332_v38 = vrot.slane %v5990_v25, 4 }
  0x1b   : > { %6125 = vst [vmem:[#allocation9_spill] sm:$0xff] %v3970_v35  ;;  %667 = vrot.lane.b32.xlu0 %v3956_v26, %s3849_s20  ;;  %v336_v39 = vshll.u32 %v3964_v31, 16  ;;  %v3985_v40 = vsel %vm3903_vm2, %v3627_v27, %v608_v28  ;;  %v5987_v41 = vshrl.u32 %v3970_v35, 16  ;;  %v320_v42 = vshll.u32 %v3970_v35, 16  ;;  %v3990_v43 = vld [vmem:[%s3901_s19 + $0x14] sm:$0xf] }
  0x1c   : > { %6126 = vst [vmem:[#allocation10_spill] sm:$0xff] %v3990_v43  ;;  %v3996_v44 = vsel %vm3903_vm2, %v610_v33, %v611_v30  ;;  %v4002_v45 = vsel %vm3903_vm2, %v571_v32, %v572_v34  ;;  %v333_v46 = vor.u32 %v332_v38, %v328_v37  ;;  %v370_v51 = vshll.u32 %v3908_v1, 16  ;;  %v4027_v61 = vld [vmem:[%s3901_s19 + $0x28] sm:$0xf]  ;;  %v4054_v32 = vld [vmem:[%s3901_s19 + $0x3c] sm:$0xf] }
  0x1d   : > { %v4004_v47 = vrot.slane %v336_v39, 5  ;;  %v319_v49 = vrot.slane %v5987_v41, 4  ;;  %v322_v50 = vrot.slane %v320_v42, 5  ;;  %v5989_v52 = vshrl.u32 %v3908_v1, 16  ;;  %6129 = vst [vmem:[#allocation11_spill] sm:$0xff] %v4027_v61  ;;  %6132 = vst [vmem:[#allocation14_spill] sm:$0xff] %v4054_v32 }
  0x1e   : > { %669 = vrot.lane.b32.xlu1 %v3978_v36, %s3849_s20  ;;  %v334_v53 = vrot.slane %v333_v46, 4  ;;  %v380_v54 = vshll.u32 %v3918_v9, 16  ;;  %v5986_v55 = vshrl.u32 %v3990_v43, 16  ;;  %v364_v56 = vshll.u32 %v3990_v43, 16  ;;  %v4063_v39 = vld [vmem:[%s3901_s19 + $0xc] sm:$0xf] }
  0x1f   : > { %675 = vrot.lane.b32.xlu0 %v3985_v40, %s3849_s20  ;;  %v323_v57 = vor.u32 %v322_v50, %v319_v49  ;;  %v372_v58 = vrot.slane %v370_v51, 5  ;;  %v376_v59 = vrot.slane %v5989_v52, 4  ;;  %v414_v60 = vshll.u32 %v3921_v10, 16  ;;  %6133 = vst [vmem:[#allocation15_spill] sm:$0xff] %v4063_v39  ;;  %v4074_v51 = vld [vmem:[%s3901_s19 + $0x10] sm:$0x1] }
  0x20   : > { %v4032_v62 = vsel %vm4010_vm5, %v334_v53, %v4004_v47  ;;  %v363_v63 = vrot.slane %v5986_v55, 4  ;;  %v366_v2 = vrot.slane %v364_v56, 5  ;;  %v4038_v6 = vrot.slane %v380_v54, 5 }
  0x21   : > { %6130 = vst [vmem:[#allocation12_spill] sm:$0xff] %v4032_v62  ;;  %v324_v4 = vrot.slane %v323_v57, 4  ;;  %v377_v5 = vor.u32 %v376_v59, %v372_v58  ;;  %v416_v7 = vrot.slane %v414_v60, 5  ;;  %v5985_v12 = vshrl.u32 %v3921_v10, 16 }
  0x22   : > { %677 = vrot.lane.b32.xlu1 %v3996_v44, %s3849_s20  ;;  %v367_v8 = vor.u32 %v366_v2, %v363_v63  ;;  %v424_v14 = vshll.u32 %v3937_v18, 16  ;;  %v5983_v15 = vshrl.u32 %v4027_v61, 16  ;;  %v408_v22 = vshll.u32 %v4027_v61, 16 }
  0x23   : > { %653 = vrot.lane.b32.xlu0 %v4002_v45, %s3849_s20  ;;  %v4047_v17 = vsel %vm4010_vm5, %v324_v4, %v328_v37  ;;  %v378_v20 = vrot.slane %v377_v5, 4  ;;  %v458_v24 = vshll.u32 %v3940_v19, 16  ;;  %v420_v28 = vrot.slane %v5985_v12, 4  ;;  %v4087_v4 = vld [vmem:[%s3901_s19 + $0x20] sm:$0xf] }
  0x24   : > { %6131 = vst [vmem:[#allocation13_spill] sm:$0xff] %v4047_v17  ;;  %v368_v27 = vrot.slane %v367_v8, 4  ;;  %v4058_v33 = vrot.slane %v424_v14, 5  ;;  %v407_v37 = vrot.slane %v5983_v15, 4  ;;  %v410_v38 = vrot.slane %v408_v22, 5  ;;  %6136 = vst [vmem:[#allocation18_spill] sm:$0xff] %v4087_v4 }
  0x25   : > { %v4070_v42 = vsel %vm4010_vm5, %v378_v20, %v4038_v6  ;;  %v421_v46 = vor.u32 %v420_v28, %v416_v7  ;;  %v460_v49 = vrot.slane %v458_v24, 5  ;;  %v5984_v50 = vshrl.u32 %v3940_v19, 16  ;;  %v226_v28 = vld [vmem:[%s3901_s19 + $0x24] sm:$0x1] }
  0x26   : > { %494 = vrot.lane.b32.xlu1 %v4032_v62, %s3850_s21  ;;  %6134 = vst [vmem:[#allocation16_spill] sm:$0xff] %v4070_v42  ;;  %v4078_v53 = vsel %vm4010_vm5, %v368_v27, %v372_v58  ;;  %v411_v54 = vor.u32 %v410_v38, %v407_v37  ;;  %v468_v56 = vshll.u32 %v3960_v29, 16  ;;  %v5982_v57 = vshrl.u32 %v4054_v32, 16 }
  0x27   : > { %492 = vrot.lane.b32.xlu0 %v4047_v17, %s3850_s21  ;;  %6135 = vst [vmem:[#allocation17_spill] sm:$0xff] %v4078_v53  ;;  %v422_v59 = vrot.slane %v421_v46, 4  ;;  %v464_v60 = vrot.slane %v5984_v50, 4  ;;  %v452_v63 = vshll.u32 %v4054_v32, 16  ;;  %v575_v2 = vrot.slane %v4063_v39, 5 }
  0x28   : > { %v412_v58 = vrot.slane %v411_v54, 4  ;;  %v4091_v5 = vrot.slane %v468_v56, 5  ;;  %v451_v8 = vrot.slane %v5982_v57, 4  ;;  %v578_v14 = vrot.slane %v4074_v51, 5  ;;  %v4146_v57 = vld [vmem:[%s3901_s19 + $0x4c] sm:$0x1] }
  0x29   : > { %v4101_v20 = vsel %vm4010_vm5, %v422_v59, %v4058_v33  ;;  %v465_v22 = vor.u32 %v464_v60, %v460_v49  ;;  %v454_v24 = vrot.slane %v452_v63, 5  ;;  %v577_v27 = vrot.slane %v575_v2, 4  ;;  %v4116_v60 = vld [vmem:[%s3901_s19 + $0x34] sm:$0xf]  ;;  %v4119_v63 = vld [vmem:[%s3901_s19 + $0x38] sm:$0x1] }
  0x2a   : > { %502 = vrot.lane.b32.xlu1 %v4070_v42, %s3850_s21  ;;  %6137 = vst [vmem:[#allocation19_spill] sm:$0xff] %v4101_v20  ;;  %v4106_v37 = vsel %vm4010_vm5, %v412_v58, %v416_v7  ;;  %v574_v38 = vrot.slane %v572_v34, 4  ;;  %v588_v46 = vrot.slane %v4087_v4, 5  ;;  %v591_v58 = vrot.slane %v226_v28, 5 }
  0x2b   : > { %500 = vrot.lane.b32.xlu0 %v4078_v53, %s3850_s21  ;;  %6138 = vst [vmem:[#allocation20_spill] sm:$0xff] %v4106_v37  ;;  %v466_v54 = vrot.slane %v465_v22, 4  ;;  %v455_v56 = vor.u32 %v454_v24, %v451_v8  ;;  %v4113_v59 = vsel %vm3903_vm2, %v577_v27, %v578_v14  ;;  %v587_v22 = vrot.slane %v585_v13, 4  ;;  %v4137_v24 = vld [vmem:[%s3901_s19 + $0x48] sm:$0xf] }
  0x2c   : > { %6139 = vst [vmem:[#allocation21_spill] sm:$0xff] %v4113_v59  ;;  %v4125_v7 = vsel %vm3903_vm2, %v574_v38, %v575_v2  ;;  %v590_v34 = vrot.slane %v588_v46, 4  ;;  %6142 = vst [vmem:[#allocation24_spill] sm:$0xff] %v4137_v24  ;;  %v601_v27 = vrot.slane %v4116_v60, 5  ;;  %v604_v38 = vrot.slane %v4119_v63, 5 }
  0x2d   : > { %6140 = vst [vmem:[#allocation22_spill] sm:$0xff] %v4125_v7  ;;  %v4132_v8 = vsel %vm4010_vm5, %v466_v54, %v4091_v5  ;;  %v456_v14 = vrot.slane %v455_v56, 4  ;;  %v4154_v56 = vsel %vm3903_vm2, %v587_v22, %v588_v46  ;;  %v600_v13 = vrot.slane %v598_v23, 4 }
  0x2e   : > { %510 = vrot.lane.b32.xlu1 %v4101_v20, %s3850_s21  ;;  %6141 = vst [vmem:[#allocation23_spill] sm:$0xff] %v4132_v8  ;;  %v4141_v2 = vsel %vm3903_vm2, %v590_v34, %v591_v58  ;;  %6145 = vst [vmem:[#allocation27_spill] sm:$0xff] %v4154_v56  ;;  %v603_v34 = vrot.slane %v601_v27, 4  ;;  %v614_v58 = vrot.slane %v4137_v24, 5  ;;  %v613_v46 = vrot.slane %v611_v30, 4 }
  0x2f   : > { %508 = vrot.lane.b32.xlu0 %v4106_v37, %s3850_s21  ;;  %6143 = vst [vmem:[#allocation25_spill] sm:$0xff] %v4141_v2  ;;  %v4150_v54 = vsel %vm4010_vm5, %v456_v14, %v460_v49  ;;  %v4165_v49 = vsel %vm3903_vm2, %v600_v13, %v601_v27  ;;  %v617_v14 = vrot.slane %v4146_v57, 5  ;;  %v346_v23 = vshll.u32 %v4063_v39, 16 }
  0x30   : > { %6144 = vst [vmem:[#allocation26_spill] sm:$0xff] %v4150_v54  ;;  %6146 = vst [vmem:[#allocation28_spill] sm:$0xff] %v4165_v49  ;;  %v4173_v22 = vsel %vm3903_vm2, %v603_v34, %v604_v38  ;;  %v616_v15 = vrot.slane %v614_v58, 4  ;;  %v5988_v50 = vshrl.u32 %v4063_v39, 16  ;;  %v4178_v12 = vsel %vm3903_vm2, %v613_v46, %v614_v58 }
  0x31   : > { %6147 = vst [vmem:[#allocation29_spill] sm:$0xff] %v4173_v22  ;;  %6148 = vst [vmem:[#allocation30_spill] sm:$0xff] %v4178_v12  ;;  %v348_v27 = vrot.slane %v346_v23, 5  ;;  %v356_v13 = vshll.u32 %v4074_v51, 16  ;;  %v5993_v34 = vshrl.u32 %v3964_v31, 16  ;;  %v775_v58 = vshrl.u32 %v3934_v16, 16 }
  0x32   : > { %518 = vrot.lane.b32.xlu1 %v4132_v8, %s3850_s21  ;;  %v4186_v30 = vsel %vm3903_vm2, %v616_v15, %v617_v14  ;;  %v352_v38 = vrot.slane %v5988_v50, 4  ;;  %v390_v46 = vshll.u32 %v4087_v4, 16  ;;  %v5994_v23 = vshrl.u32 %v4087_v4, 16 }
  0x33   : > { %516 = vrot.lane.b32.xlu0 %v4150_v54, %s3850_s21  ;;  %6149 = vst [vmem:[#allocation31_spill] sm:$0xff] %v4186_v30  ;;  %v358_v51 = vrot.slane %v356_v13, 5  ;;  %v342_v0 = vrot.slane %v5993_v34, 4  ;;  %v400_v15 = vshll.u32 %v226_v28, 16  ;;  %v5999_v14 = vshrl.u32 %v3918_v9, 16 }
  0x34   : > { %v353_v41 = vor.u32 %v352_v38, %v348_v27  ;;  %v392_v50 = vrot.slane %v390_v46, 5  ;;  %v396_v52 = vrot.slane %v5994_v23, 4  ;;  %v434_v25 = vshll.u32 %v4116_v60, 16 }
  0x35   : > { %v6004_v55 = vshrl.u32 %v4116_v60, 16  ;;  %v343_v38 = vor.u32 %v342_v0, %v4004_v47  ;;  %v402_v39 = vrot.slane %v400_v15, 5  ;;  %v386_v28 = vrot.slane %v5999_v14, 4 }
  0x36   : > { %526 = vrot.lane.b32.xlu1 %v4032_v62, %s3849_s20  ;;  %v354_v13 = vrot.slane %v353_v41, 4  ;;  %v397_v46 = vor.u32 %v396_v52, %v392_v50  ;;  %v436_v34 = vrot.slane %v434_v25, 5  ;;  %v444_v4 = vshll.u32 %v4119_v63, 16 }
  0x37   : > { %524 = vrot.lane.b32.xlu0 %v4047_v17, %s3849_s20  ;;  %v440_v23 = vrot.slane %v6004_v55, 4  ;;  %v344_v41 = vrot.slane %v343_v38, 4  ;;  %v387_v47 = vor.u32 %v386_v28, %v4038_v6  ;;  %v6002_v0 = vshrl.u32 %v3937_v18, 16 }
  0x38   : > { %v4215_v31 = vsel %vm4010_vm5, %v354_v13, %v358_v51  ;;  %v908_v15 = vshrl.u32 %v3949_v21, 16  ;;  %v398_v14 = vrot.slane %v397_v46, 4  ;;  %v446_v52 = vrot.slane %v444_v4, 5 }
  0x39   : > { %6150 = vst [vmem:[#allocation32_spill] sm:$0xff] %v4215_v31  ;;  %v441_v9 = vor.u32 %v440_v23, %v436_v34  ;;  %v4224_v25 = vsel %vm4010_vm5, %v344_v41, %v348_v27  ;;  %v388_v63 = vrot.slane %v387_v47, 4  ;;  %v430_v51 = vrot.slane %v6002_v0, 4 }
  0x3a   : > { %534 = vrot.lane.b32.xlu1 %v4070_v42, %s3849_s20  ;;  %6151 = vst [vmem:[#allocation33_spill] sm:$0xff] %v4224_v25  ;;  %v478_v6 = vshll.u32 %v4137_v24, 16  ;;  %v907_v13 = vshrl.u32 %v4002_v45, 16  ;;  %v4234_v4 = vsel %vm4010_vm5, %v398_v14, %v402_v39  ;;  %v6003_v38 = vshrl.u32 %v4137_v24, 16 }
  0x3b   : > { %532 = vrot.lane.b32.xlu0 %v4078_v53, %s3849_s20  ;;  %6152 = vst [vmem:[#allocation34_spill] sm:$0xff] %v4234_v4  ;;  %v442_v23 = vrot.slane %v441_v9, 4  ;;  %v915_v27 = vshrl.u32 %v3978_v36, 16  ;;  %v4240_v28 = vsel %vm4010_vm5, %v388_v63, %v392_v50  ;;  %v431_v46 = vor.u32 %v430_v51, %v4058_v33 }
  0x3c   : > { %6153 = vst [vmem:[#allocation35_spill] sm:$0xff] %v4240_v28  ;;  %v480_v41 = vrot.slane %v478_v6, 5  ;;  %v916_v47 = vshrl.u32 %v3996_v44, 16  ;;  %v484_v9 = vrot.slane %v6003_v38, 4  ;;  %v488_v39 = vshll.u32 %v4146_v57, 16 }
  0x3d   : > { %v4246_v0 = vsel %vm4010_vm5, %v442_v23, %v446_v52  ;;  %v432_v14 = vrot.slane %v431_v46, 4  ;;  %v6005_v50 = vshrl.u32 %v3960_v29, 16  ;;  %v4258_v51 = vpack.i.b16 %v908_v15, %v907_v13 }
  0x3e   : > { %542 = vrot.lane.b32.xlu1 %v4101_v20, %s3849_s20  ;;  %6154 = vst [vmem:[#allocation36_spill] sm:$0xff] %v4246_v0  ;;  %v485_v63 = vor.u32 %v484_v9, %v480_v41  ;;  %v490_v52 = vrot.slane %v488_v39, 5  ;;  %v6156_v46 = vshrl.u32 %v3925_v11, 16  ;;  %v783_v15 = vshrl.u32 %v3956_v26, 16 }
  0x3f   : > { %540 = vrot.lane.b32.xlu0 %v4106_v37, %s3849_s20  ;;  %v4264_v57 = vsel %vm4010_vm5, %v432_v14, %v436_v34  ;;  %v474_v23 = vrot.slane %v6005_v50, 4  ;;  %v784_v13 = vshrl.u32 %v3985_v40, 16  ;;  %v4276_v55 = vpack.i.b16 %v916_v47, %v915_v27 }
  0x40   : > { %6155 = vst [vmem:[#allocation37_spill] sm:$0xff] %v4264_v57  ;;  %v4270_v38 = vpack.i.b16 %v6156_v46, %v775_v58  ;;  %v486_v39 = vrot.slane %v485_v63, 4  ;;  %v6162_v47 = vshrl.u32 %v3908_v1, 16  ;;  %v6165_v48 = vshrl.u32 %v3990_v43, 16 }
  0x41   : > { %6157 = vst [vmem:[#allocation38_spill] sm:$0xff] %v4276_v55  ;;  %v475_v34 = vor.u32 %v474_v23, %v4091_v5  ;;  %v4289_v50 = vpack.i.b16 %v784_v13, %v783_v15  ;;  %v6161_v5 = vshrl.u32 %v3912_v3, 16  ;;  %v6167_v23 = vshrl.u32 %v3921_v10, 16 }
  0x42   : > { %550 = vrot.lane.b32.xlu1 %v4132_v8, %s3849_s20  ;;  %v4285_v58 = vsel %vm4010_vm5, %v486_v39, %v490_v52  ;;  %v6164_v52 = vshrl.u32 %v3970_v35, 16  ;;  %v6168_v15 = vshrl.u32 %v3940_v19, 16  ;;  %v6170_v39 = vshrl.u32 %v4027_v61, 16 }
  0x43   : > { %548 = vrot.lane.b32.xlu0 %v4150_v54, %s3849_s20  ;;  %6158 = vst [vmem:[#allocation39_spill] sm:$0xff] %v4285_v58  ;;  %v476_v46 = vrot.slane %v475_v34, 4  ;;  %6159 = vst [vmem:[#allocation40_spill] sm:$0xff] %v4289_v50  ;;  %v4303_v63 = vpack.i.b16 %v6162_v47, %v6161_v5  ;;  %v6171_v34 = vshrl.u32 %v4054_v32, 16  ;;  %v859_v5 = vshrl.u32 %v4032_v62, 16 }
  0x44   : > { %v4323_v13 = vpack.i.b16 %v6168_v15, %v6167_v23  ;;  %v860_v47 = vshrl.u32 %v4070_v42, 16  ;;  %v736_v6 = vshrl.u32 %v4150_v54, 16  ;;  %v3852_v62 = vmov 1934713408  }
  0x45   : > { %v4295_v27 = vsel %vm4010_vm5, %v476_v46, %v480_v41  ;;  %6163 = vst [vmem:[#allocation42_spill] sm:$0xff] %v4303_v63  ;;  %v4313_v41 = vpack.i.b16 %v6165_v48, %v6164_v52  ;;  %v4333_v46 = vpack.i.b16 %v6171_v34, %v6170_v39  ;;  %v727_v52 = vshrl.u32 %v4047_v17, 16 }
  0x46   : > { %621 = vrot.lane.b32.xlu1 %v4002_v45, %s3850_s21  ;;  %6160 = vst [vmem:[#allocation41_spill] sm:$0xff] %v4295_v27  ;;  %6169 = vst [vmem:[#allocation44_spill] sm:$0xff] %v4323_v13  ;;  %v728_v48 = vshrl.u32 %v4078_v53, 16  ;;  %v4349_v15 = vpack.i.b16 %v860_v47, %v859_v5  ;;  %v867_v39 = vshrl.u32 %v4101_v20, 16  ;;  %v868_v34 = vshrl.u32 %v4132_v8, 16 }
  0x47   : > { %619 = vrot.lane.b32.xlu0 %v3934_v16, %s3850_s21  ;;  %6166 = vst [vmem:[#allocation43_spill] sm:$0xff] %v4313_v41  ;;  %6172 = vst [vmem:[#allocation45_spill] sm:$0xff] %v4333_v46  ;;  %v735_v47 = vshrl.u32 %v4106_v37, 16 }
  0x48   : > { %6173 = vst [vmem:[#allocation46_spill] sm:$0xff] %v4349_v15  ;;  %v4357_v9 = vpack.i.b16 %v728_v48, %v727_v52  ;;  %v4363_v5 = vpack.i.b16 %v868_v34, %v867_v39 }
  0x49   : > { %v4375_v48 = vpack.i.b16 %v736_v6, %v735_v47 }
  0x4a   : > { %629 = vrot.lane.b32.xlu1 %v3949_v21, %s3850_s21  ;;  %6174 = vst [vmem:[#allocation47_spill] sm:$0xff] %v4357_v9  ;;  %6175 = vst [vmem:[#allocation48_spill] sm:$0xff] %v4363_v5  ;;  %v1215_v9 = vlaneseq }
  0x4b   : > { %627 = vrot.lane.b32.xlu0 %v3925_v11, %s3850_s21  ;;  %6176 = vst [vmem:[#allocation49_spill] sm:$0xff] %v4375_v48 }
  0x4c   : > { %v1216_v15 = vshrl.u32 %v1215_v9, 7 }
  0x4e   : > { %637 = vrot.lane.b32.xlu1 %v3978_v36, %s3850_s21 }
  0x4f   : > { %635 = vrot.lane.b32.xlu0 %v3956_v26, %s3850_s21 }
  0x52   : > { %645 = vrot.lane.b32.xlu1 %v3996_v44, %s3850_s21 }
  0x53   : > { %643 = vrot.lane.b32.xlu0 %v3985_v40, %s3850_s21 }
  0x56   : > { %251 = vrot.lane.b32.xlu1 %v3912_v3, %s3850_s21 }
  0x57   : > { %249 = vrot.lane.b32.xlu0 %v3970_v35, %s3850_s21 }
  0x5a   : > { %259 = vrot.lane.b32.xlu1 %v3908_v1, %s3850_s21 }
  0x5b   : > { %257 = vrot.lane.b32.xlu0 %v3990_v43, %s3850_s21 }
  0x5e   : > { %267 = vrot.lane.b32.xlu1 %v3921_v10, %s3850_s21 }
  0x5f   : > { %265 = vrot.lane.b32.xlu0 %v4027_v61, %s3850_s21 }
  0x62   : > { %275 = vrot.lane.b32.xlu1 %v3940_v19, %s3850_s21 }
  0x63   : > { %273 = vrot.lane.b32.xlu0 %v4054_v32, %s3850_s21 }
  0x66   : > { %283 = vrot.lane.b32.xlu1 %v3912_v3, %s3849_s20 }
  0x67   : > { %281 = vrot.lane.b32.xlu0 %v3970_v35, %s3849_s20 }
  0x6a   : > { %291 = vrot.lane.b32.xlu1 %v3908_v1, %s3849_s20 }
  0x6b   : > { %289 = vrot.lane.b32.xlu0 %v3990_v43, %s3849_s20 }
  0x6e   : > { %299 = vrot.lane.b32.xlu1 %v3921_v10, %s3849_s20 }
  0x6f   : > { %297 = vrot.lane.b32.xlu0 %v4027_v61, %s3849_s20 }
  0x72   : > { %307 = vrot.lane.b32.xlu1 %v3940_v19, %s3849_s20 }
  0x73   : > { %305 = vrot.lane.b32.xlu0 %v4054_v32, %s3849_s20 }
  0x76   : > { %657 = vrot.lane.b32.xlu1 %v4113_v59, %s3849_s20 }
  0x77   : > { %655 = vrot.lane.b32.xlu0 %v4125_v7, %s3849_s20 }
  0x7a   : > { %665 = vrot.lane.b32.xlu1 %v4141_v2, %s3849_s20 }
  0x7b   : > { %663 = vrot.lane.b32.xlu0 %v4154_v56, %s3849_s20 }
  0x7e   : > { %673 = vrot.lane.b32.xlu1 %v4173_v22, %s3849_s20 }
  0x7f   : > { %671 = vrot.lane.b32.xlu0 %v4165_v49, %s3849_s20 }
  0x82   : > { %681 = vrot.lane.b32.xlu1 %v4186_v30, %s3849_s20 }
  0x83   : > { %679 = vrot.lane.b32.xlu0 %v4178_v12, %s3849_s20 }
  0x86   : > { %498 = vrot.lane.b32.xlu1 %v4215_v31, %s3850_s21 }
  0x87   : > { %496 = vrot.lane.b32.xlu0 %v4224_v25, %s3850_s21 }
  0x88   : > { %v4407_v6 = vpop.permute.xlu1 %659 }
  0x89   : > { %v4409_v39 = vpop.permute.xlu0 %651 }
  0x8a   : > { %506 = vrot.lane.b32.xlu1 %v4234_v4, %s3850_s21 }
  0x8b   : > { %504 = vrot.lane.b32.xlu0 %v4240_v28, %s3850_s21 }
  0x8c   : > { %v4415_v34 = vpop.permute.xlu1 %661 }
  0x8d   : > { %v668_v47 = vpop.permute.xlu0 %667 }
  0x8e   : > { %514 = vrot.lane.b32.xlu1 %v4246_v0, %s3850_s21 }
  0x8f   : > { %512 = vrot.lane.b32.xlu0 %v4264_v57, %s3850_s21 }
  0x90   : > { %v670_v52 = vpop.permute.xlu1 %669 }
  0x91   : > { %v676_v23 = vpop.permute.xlu0 %675 }
  0x92   : > { %522 = vrot.lane.b32.xlu1 %v4285_v58, %s3850_s21  ;;  %v811_v42 = vpack.i.b16 %v676_v23, %v668_v47 }
  0x93   : > { %520 = vrot.lane.b32.xlu0 %v4295_v27, %s3850_s21 }
  0x94   : > { %v678_v14 = vpop.permute.xlu1 %677 }
  0x95   : > { %v654_v33 = vpop.permute.xlu0 %653  ;;  %v943_v41 = vpack.i.b16 %v678_v14, %v670_v52  ;;  %v945_v63 = vshrl.u32 %v678_v14, 16 }
  0x96   : > { %530 = vrot.lane.b32.xlu1 %v4215_v31, %s3849_s20  ;;  %v937_v50 = vpack.i.b16 %v4415_v34, %v654_v33 }
  0x97   : > { %528 = vrot.lane.b32.xlu0 %v4224_v25, %s3849_s20 }
  0x98   : > { %v4429_v48 = vpop.permute.xlu1 %494 }
  0x99   : > { %6177 = vst [vmem:[#allocation50_spill] sm:$0xff] %v4429_v48  ;;  %v4431_v5 = vpop.permute.xlu0 %492 }
  0x9a   : > { %538 = vrot.lane.b32.xlu1 %v4234_v4, %s3849_s20 }
  0x9b   : > { %536 = vrot.lane.b32.xlu0 %v4240_v28, %s3849_s20  ;;  %v3851_v28 = vmov 1983009808  }
  0x9c   : > { %v4437_v37 = vpop.permute.xlu1 %502  ;;  %v1213_v4 = vunpack.c.l.s4 %v3851_v28  ;;  %v812_v28 = vshrl.u32 %v668_v47, 16 }
  0x9d   : > { %v4439_v54 = vpop.permute.xlu0 %500 }
  0x9e   : > { %546 = vrot.lane.b32.xlu1 %v4246_v0, %s3849_s20  ;;  %v807_v0 = vshrl.u32 %v4407_v6, 16 }
  0x9f   : > { %544 = vrot.lane.b32.xlu0 %v4264_v57, %s3849_s20  ;;  %v813_v57 = vshrl.u32 %v676_v23, 16 }
  0xa0   : > { %v4445_v25 = vpop.permute.xlu1 %510 }
  0xa1   : > { %v4447_v31 = vpop.permute.xlu0 %508  ;;  %v814_v46 = vpack.i.b16 %v813_v57, %v812_v28  ;;  %v939_v57 = vshrl.u32 %v4415_v34, 16 }
  0xa2   : > { %554 = vrot.lane.b32.xlu1 %v4285_v58, %s3849_s20  ;;  %v1214_v58 = vunpack.c.0.s8 %v1213_v4  ;;  %v805_v4 = vpack.i.b16 %v4407_v6, %v4409_v39 }
  0xa3   : > { %552 = vrot.lane.b32.xlu0 %v4295_v27, %s3849_s20  ;;  %v806_v27 = vshrl.u32 %v4409_v39, 16 }
  0xa4   : > { %v4453_v20 = vpop.permute.xlu1 %518 }
  0xa5   : > { %v4455_v8 = vpop.permute.xlu0 %516  ;;  %v808_v9 = vpack.i.b16 %v807_v0, %v806_v27  ;;  %v884_v10 = vshrl.u32 %v4453_v20, 16 }
  0xa6   : > { %625 = vrot.lane.b32.xlu1 %v4113_v59, %s3850_s21  ;;  %v1230_v59 = vunpack.c.l.s4 %v3852_v62 }
  0xa7   : > { %623 = vrot.lane.b32.xlu0 %v4125_v7, %s3850_s21  ;;  %v4471_v7 = vsub.s32 %v1214_v58, %v1216_v15  ;;  %v944_v58 = vshrl.u32 %v670_v52, 16 }
  0xa8   : > { %v4463_v17 = vpop.permute.xlu1 %526  ;;  %v1231_v62 = vunpack.c.0.s8 %v1230_v59 }
  0xa9   : > { %v4465_v53 = vpop.permute.xlu0 %524  ;;  %v1498_v23 = vrot.slane %v811_v42, %v4471_v7  ;;  %v1532_v0 = vrot.slane %v814_v46, %v4471_v7  ;;  %v1490_v14 = vrot.slane %v805_v4, %v4471_v7  ;;  %v946_v6 = vpack.i.b16 %v945_v63, %v944_v58 }
  0xaa   : > { %633 = vrot.lane.b32.xlu1 %v4141_v2, %s3850_s21  ;;  %v938_v2 = vshrl.u32 %v654_v33, 16  ;;  %v1524_v33 = vrot.slane %v808_v9, %v4471_v7  ;;  %v1838_v39 = vrot.slane %v943_v41, %v4471_v7  ;;  %v1830_v34 = vrot.slane %v937_v50, %v4471_v7 }
  0xab   : > { %631 = vrot.lane.b32.xlu0 %v4154_v56, %s3850_s21  ;;  %v1499_v42 = vcombine.low %v1490_v14, %v1498_v23  ;;  %v1500_v46 = vcombine.high %v1490_v14, %v1498_v23  ;;  %v4499_v47 = vsub.s32 %v1231_v62, %v1216_v15  ;;  %v1872_v63 = vrot.slane %v946_v6, %v4471_v7  ;;  %v6180_v23 = vld [vmem:[#allocation8_spill] sm:$0xff] }
  0xac   : > { %v4475_v13 = vpop.permute.xlu1 %534  ;;  %v940_v59 = vpack.i.b16 %v939_v57, %v938_v2  ;;  %v1534_v28 = vcombine.high %v1524_v33, %v1532_v0  ;;  %v1840_v2 = vcombine.high %v1830_v34, %v1838_v39  ;;  %v1533_v9 = vcombine.low %v1524_v33, %v1532_v0  ;;  %v6179_v57 = vld [vmem:[#allocation15_spill] sm:$0xff] }
  0xad   : > { %v4478_v55 = vpop.permute.xlu0 %532  ;;  %6178 = vst [vmem:[#allocation51_spill] sm:$0xff] %v4499_v47  ;;  %v1839_v58 = vcombine.low %v1830_v34, %v1838_v39  ;;  %v4515_v62 = vrot.slane %v1500_v46, %v4499_v47  ;;  %v4518_v14 = vrot.slane %v1499_v42, %v4499_v47  ;;  %v876_v46 = vshrl.u32 %v4437_v37, 16 }
  0xae   : > { %641 = vrot.lane.b32.xlu1 %v4173_v22, %s3850_s21  ;;  %v1864_v50 = vrot.slane %v940_v59, %v4471_v7  ;;  %v4512_v15 = vrot.slane %v1534_v28, %v4499_v47  ;;  %v4534_v42 = vrot.slane %v1533_v9, %v4499_v47  ;;  %v875_v33 = vshrl.u32 %v4429_v48, 16  ;;  %v6185_v59 = vld [vmem:[#allocation18_spill] sm:$0xff] }
  0xaf   : > { %639 = vrot.lane.b32.xlu0 %v4165_v49, %s3850_s21  ;;  %6182 = vst [vmem:[#allocation8_spill] sm:$0xff] %v4515_v62  ;;  %6183 = vst [vmem:[#allocation52_spill] sm:$0xff] %v4518_v14  ;;  %v744_v39 = vshrl.u32 %v4439_v54, 16  ;;  %v6186_v49 = vld [vmem:[#allocation4_spill] sm:$0xff]  ;;  %v883_v56 = vshrl.u32 %v4445_v25, 16  ;;  %v752_v14 = vshrl.u32 %v4455_v8, 16 }
  0xb0   : > { %v4489_v27 = vpop.permute.xlu1 %542  ;;  %6181 = vst [vmem:[#allocation15_spill] sm:$0xff] %v4512_v15  ;;  %v1874_v34 = vcombine.high %v1864_v50, %v1872_v63  ;;  %v1873_v0 = vcombine.low %v1864_v50, %v1872_v63  ;;  %v4553_v50 = vrot.slane %v1839_v58, %v4499_v47  ;;  %v4562_v61 = vpack.i.b16 %v876_v46, %v875_v33 }
  0xb1   : > { %v4493_v52 = vpop.permute.xlu0 %540  ;;  %v751_v46 = vshrl.u32 %v4447_v31, 16  ;;  %v760_v9 = vshrl.u32 %v4478_v55, 16  ;;  %v891_v62 = vshrl.u32 %v4463_v17, 16  ;;  %v759_v35 = vshrl.u32 %v4465_v53, 16 }
  0xb2   : > { %649 = vrot.lane.b32.xlu1 %v4186_v30, %s3850_s21  ;;  %v743_v30 = vshrl.u32 %v4431_v5, 16  ;;  %6187 = vst [vmem:[#allocation18_spill] sm:$0xff] %v4553_v50  ;;  %v4567_v58 = vrot.slane %v1874_v34, %v4499_v47  ;;  %v4578_v33 = vrot.slane %v1873_v0, %v4499_v47  ;;  %v892_v34 = vshrl.u32 %v4475_v13, 16 }
  0xb3   : > { %647 = vrot.lane.b32.xlu0 %v4178_v12, %s3850_s21  ;;  %v4537_v12 = vrot.slane %v1840_v2, %v4499_v47  ;;  %v4595_v47 = vpack.i.b16 %v752_v14, %v751_v46  ;;  %v4605_v15 = vpack.i.b16 %v760_v9, %v759_v35  ;;  %v767_v14 = vshrl.u32 %v4493_v52, 16 }
  0xb4   : > { %v4501_v4 = vpop.permute.xlu1 %550  ;;  %6188 = vst [vmem:[#allocation4_spill] sm:$0xff] %v4567_v58  ;;  %v4571_v32 = vpack.i.b16 %v744_v39, %v743_v30  ;;  %6189 = vst [vmem:[#allocation54_spill] sm:$0xff] %v4578_v33  ;;  %v4587_v39 = vpack.i.b16 %v884_v10, %v883_v56  ;;  %v4603_v22 = vpack.i.b16 %v892_v34, %v891_v62  ;;  %v899_v33 = vshrl.u32 %v4489_v27, 16 }
  0xb5   : > { %v4505_v41 = vpop.permute.xlu0 %548  ;;  %6184 = vst [vmem:[#allocation53_spill] sm:$0xff] %v4537_v12  ;;  %v6190_v62 = vpack.i.b16 %v3949_v21, %v4002_v45  ;;  %v6192_v45 = vpack.i.b16 %v3996_v44, %v3978_v36  ;;  %v6194_v44 = vld [vmem:[#allocation38_spill] sm:$0xff] }
  0xb6   : > { %255 = vrot.lane.b32.xlu1 %v6179_v57, %s3850_s21  ;;  %v768_v46 = vshrl.u32 %v4505_v41, 16 }
  0xb7   : > { %253 = vrot.lane.b32.xlu0 %v6180_v23, %s3850_s21 }
  0xb8   : > { %v4520_v6 = vpop.permute.xlu1 %621 }
  0xb9   : > { %v4531_v28 = vpop.permute.xlu0 %619  ;;  %v923_v43 = vshrl.u32 %v4520_v6, 16 }
  0xba   : > { %263 = vrot.lane.b32.xlu1 %v6185_v59, %s3850_s21  ;;  %v791_v56 = vshrl.u32 %v4531_v28, 16 }
  0xbb   : > { %261 = vrot.lane.b32.xlu0 %v6186_v49, %s3850_s21 }
  0xbc   : > { %v630_v19 = vpop.permute.xlu1 %629 }
  0xbd   : > { %v628_v2 = vpop.permute.xlu0 %627  ;;  %v924_v63 = vshrl.u32 %v630_v19, 16  ;;  %v921_v3 = vpack.i.b16 %v630_v19, %v4520_v6  ;;  %v900_v6 = vshrl.u32 %v4501_v4, 16 }
  0xbe   : > { %271 = vrot.lane.b32.xlu1 %v4116_v60, %s3850_s21  ;;  %v792_v0 = vshrl.u32 %v628_v2, 16  ;;  %v789_v30 = vpack.i.b16 %v628_v2, %v4531_v28 }
  0xbf   : > { %269 = vrot.lane.b32.xlu0 %v3937_v18, %s3850_s21  ;;  %v925_v19 = vpack.i.b16 %v924_v63, %v923_v43  ;;  %v1755_v34 = vcombine.low %v6190_v62, %v921_v3  ;;  %v6191_v43 = vpack.i.b16 %v3925_v11, %v3934_v16 }
  0xc0   : > { %v638_v12 = vpop.permute.xlu1 %637  ;;  %v793_v28 = vpack.i.b16 %v792_v0, %v791_v56  ;;  %v897_v0 = vpack.i.b16 %v4501_v4, %v4489_v27 }
  0xc1   : > { %v636_v1 = vpop.permute.xlu0 %635  ;;  %v931_v35 = vshrl.u32 %v638_v12, 16  ;;  %v1415_v63 = vcombine.low %v6191_v43, %v789_v30  ;;  %v1789_v21 = vcombine.low %v4258_v51, %v925_v19  ;;  %v901_v51 = vpack.i.b16 %v900_v6, %v899_v33 }
  0xc2   : > { %279 = vrot.lane.b32.xlu1 %v4137_v24, %s3850_s21  ;;  %v1449_v11 = vcombine.low %v4270_v38, %v793_v28  ;;  %v4638_v30 = vrot.slane %v1755_v34, %v4471_v7  ;;  %v6196_v43 = vpack.i.b16 %v4455_v8, %v4447_v31 }
  0xc3   : > { %277 = vrot.lane.b32.xlu0 %v3960_v29, %s3850_s21  ;;  %v799_v29 = vshrl.u32 %v636_v1, 16  ;;  %v1729_v62 = vcombine.low %v4587_v39, %v901_v51  ;;  %v1721_v39 = vcombine.low %v4562_v61, %v4603_v22  ;;  %v1381_v61 = vcombine.low %v4571_v32, %v4605_v15 }
  0xc4   : > { %v646_v2 = vpop.permute.xlu1 %645  ;;  %v4668_v19 = vrot.slane %v1449_v11, %v4471_v7  ;;  %v6199_v22 = vpack.i.b16 %v4453_v20, %v4445_v25 }
  0xc5   : > { %v929_v9 = vpack.i.b16 %v646_v2, %v638_v12  ;;  %v932_v10 = vshrl.u32 %v646_v2, 16  ;;  %v644_v24 = vpop.permute.xlu0 %643  ;;  %v889_v2 = vpack.i.b16 %v4475_v13, %v4463_v17 }
  0xc6   : > { %v797_v58 = vpack.i.b16 %v644_v24, %v636_v1  ;;  %v800_v48 = vshrl.u32 %v644_v24, 16  ;;  %287 = vrot.lane.b32.xlu1 %v6179_v57, %s3849_s20  ;;  %v765_v1 = vpack.i.b16 %v4505_v41, %v4493_v52  ;;  %v6193_v24 = vpack.i.b16 %v3985_v40, %v3956_v26  ;;  %v6195_v40 = vld [vmem:[#allocation40_spill] sm:$0xff] }
  0xc7   : > { %v933_v3 = vpack.i.b16 %v932_v10, %v931_v35  ;;  %v1763_v12 = vcombine.low %v6192_v45, %v929_v9  ;;  %285 = vrot.lane.b32.xlu0 %v6180_v23, %s3849_s20  ;;  %v769_v52 = vpack.i.b16 %v768_v46, %v767_v14  ;;  %v6198_v45 = vpack.i.b16 %v4439_v54, %v4431_v5  ;;  %v6202_v5 = vld [vmem:[#allocation4_spill] sm:$0xff]  ;;  %v6210_v14 = vld [vmem:[#allocation43_spill] sm:$0xff] }
  0xc8   : > { %v801_v16 = vpack.i.b16 %v800_v48, %v799_v29  ;;  %v1423_v27 = vcombine.low %v6193_v24, %v797_v58  ;;  %v4635_v4 = vpop.permute.xlu1 %251  ;;  %v4647_v29 = vrot.slane %v1415_v63, %v4471_v7  ;;  %v4656_v48 = vrot.slane %v1789_v21, %v4471_v7  ;;  %v6200_v24 = vld [vmem:[#allocation50_spill] sm:$0xff]  ;;  %v6211_v35 = vld [vmem:[#allocation44_spill] sm:$0xff] }
  0xc9   : > { %v4641_v36 = vrot.slane %v1763_v12, %v4471_v7  ;;  %v1797_v10 = vcombine.low %v6194_v44, %v933_v3  ;;  %v4644_v56 = vpop.permute.xlu0 %249  ;;  %v1355_v63 = vcombine.low %v6196_v43, %v765_v1  ;;  %v1389_v21 = vcombine.low %v4595_v47, %v769_v52 }
  0xca   : > { %v4650_v26 = vrot.slane %v1423_v27, %v4471_v7  ;;  %v1457_v38 = vcombine.low %v6195_v40, %v801_v16  ;;  %295 = vrot.lane.b32.xlu1 %v6185_v59, %s3849_s20  ;;  %v6197_v47 = vpack.i.b16 %v4478_v55, %v4465_v53  ;;  %v1695_v1 = vcombine.low %v6199_v22, %v897_v0  ;;  %v6203_v0 = vld [vmem:[#allocation24_spill] sm:$0xff]  ;;  %v6205_v40 = vld [vmem:[#allocation7_spill] sm:$0xff] }
  0xcb   : > { %v4663_v33 = vrot.slane %v1797_v10, %v4471_v7  ;;  %293 = vrot.lane.b32.xlu0 %v6186_v49, %s3849_s20  ;;  %v6201_v27 = vpack.i.b16 %v4437_v37, %v6200_v24  ;;  %v1736_v55 = vrot.slane %v1729_v62, %v4471_v7  ;;  %v827_v53 = vshrl.u32 %v4635_v4, 16  ;;  %v6204_v37 = vld [vmem:[#allocation54_spill] sm:$0xff] }
  0xcc   : > { %v4675_v46 = vrot.slane %v1457_v38, %v4471_v7  ;;  %v4677_v28 = vpop.permute.xlu1 %259  ;;  %v1347_v12 = vcombine.low %v6198_v45, %v6197_v47  ;;  %v3669_v32 = vcombine.low %v6202_v5, %v6202_v5  ;;  %v1362_v20 = vrot.slane %v1355_v63, %v4471_v7 }
  0xcd   : > { %v4682_v34 = vpop.permute.xlu0 %257  ;;  %v828_v3 = vshrl.u32 %v4677_v28, 16  ;;  %v1687_v51 = vcombine.low %v6201_v27, %v889_v2  ;;  %v1396_v25 = vrot.slane %v1389_v21, %v4471_v7  ;;  %v695_v15 = vshrl.u32 %v4644_v56, 16 }
  0xce   : > { %303 = vrot.lane.b32.xlu1 %v4116_v60, %s3849_s20  ;;  %v696_v11 = vshrl.u32 %v4682_v34, 16  ;;  %v3657_v44 = vcombine.low %v6204_v37, %v6204_v37  ;;  %v1728_v10 = vrot.slane %v1721_v39, %v4471_v7  ;;  %v1354_v62 = vrot.slane %v1347_v12, %v4471_v7 }
  0xcf   : > { %301 = vrot.lane.b32.xlu0 %v3937_v18, %s3849_s20  ;;  %v829_v52 = vpack.i.b16 %v828_v3, %v827_v53  ;;  %v1388_v43 = vrot.slane %v1381_v61, %v4471_v7  ;;  %v1702_v63 = vrot.slane %v1695_v1, %v4471_v7  ;;  %v1694_v39 = vrot.slane %v1687_v51, %v4471_v7  ;;  %v6206_v61 = vld [vmem:[#allocation15_spill] sm:$0xff]  ;;  %v6208_v51 = vld [vmem:[#allocation42_spill] sm:$0xff] }
  0xd0   : > { %v4719_v16 = vpop.permute.xlu1 %267  ;;  %v697_v21 = vpack.i.b16 %v696_v11, %v695_v15  ;;  %v1738_v24 = vcombine.high %v1728_v10, %v1736_v55  ;;  %v1364_v27 = vcombine.high %v1354_v62, %v1362_v20  ;;  %v6207_v1 = vcombine.low %v6206_v61, %v6206_v61 }
  0xd1   : > { %v4726_v54 = vpop.permute.xlu0 %265  ;;  %v835_v3 = vshrl.u32 %v4719_v16, 16  ;;  %v1398_v11 = vcombine.high %v1388_v43, %v1396_v25  ;;  %v1585_v15 = vcombine.low %v6208_v51, %v829_v52  ;;  %v6209_v2 = vcombine.low %v4534_v42, %v4534_v42 }
  0xd2   : > { %311 = vrot.lane.b32.xlu1 %v6203_v0, %s3849_s20  ;;  %v703_v53 = vshrl.u32 %v4726_v54, 16  ;;  %v1397_v38 = vcombine.low %v1388_v43, %v1396_v25  ;;  %v1737_v8 = vcombine.low %v1728_v10, %v1736_v55  ;;  %v1704_v31 = vcombine.high %v1694_v39, %v1702_v63  ;;  %v6213_v25 = vld [vmem:[#allocation45_spill] sm:$0xff] }
  0xd3   : > { %309 = vrot.lane.b32.xlu0 %v6205_v40, %s3849_s20  ;;  %v1363_v41 = vcombine.low %v1354_v62, %v1362_v20  ;;  %v1245_v58 = vcombine.low %v6210_v14, %v697_v21  ;;  %v1703_v6 = vcombine.low %v1694_v39, %v1702_v63  ;;  %v693_v55 = vpack.i.b16 %v4682_v34, %v4644_v56  ;;  %v6218_v62 = vld [vmem:[#allocation3_spill] sm:$0xff]  ;;  %v6221_v39 = vld [vmem:[#allocation10_spill] sm:$0xff] }
  0xd4   : > { %v4747_v47 = vpop.permute.xlu1 %275 }
  0xd5   : > { %v836_v45 = vshrl.u32 %v4747_v47, 16  ;;  %v4752_v22 = vpop.permute.xlu0 %273 }
  0xd6   : > { %v704_v12 = vshrl.u32 %v4752_v22, 16  ;;  %2671 = vrot.lane.b32.xlu1 %v6207_v1, %s3853_s22  ;;  %v825_v1 = vpack.i.b16 %v4677_v28, %v4635_v4  ;;  %v4785_v4 = vrot.slane %v1585_v15, %v4471_v7 }
  0xd7   : > { %v837_v9 = vpack.i.b16 %v836_v45, %v835_v3  ;;  %2601 = vrot.lane.b32.xlu0 %v6209_v2, %s3853_s22  ;;  %v6212_v45 = vld [vmem:[#allocation51_spill] sm:$0xff] }
  0xd8   : > { %v705_v13 = vpack.i.b16 %v704_v12, %v703_v53  ;;  %v284_v17 = vpop.permute.xlu1 %283  ;;  %v4772_v51 = vrot.slane %v1738_v24, %v6212_v45  ;;  %v4779_v14 = vrot.slane %v1398_v11, %v6212_v45  ;;  %v4782_v10 = vrot.slane %v1364_v27, %v6212_v45  ;;  %v6244_v11 = vld [vmem:[#allocation16_spill] sm:$0xff] }
  0xd9   : > { %v1593_v52 = vcombine.low %v6211_v35, %v837_v9  ;;  %v4769_v3 = vpop.permute.xlu0 %281  ;;  %v4792_v56 = vrot.slane %v1397_v38, %v6212_v45  ;;  %v4795_v34 = vrot.slane %v1737_v8, %v6212_v45  ;;  %v4798_v35 = vrot.slane %v1245_v58, %v4471_v7  ;;  %v6245_v58 = vld [vmem:[#allocation12_spill] sm:$0xff] }
  0xda   : > { %v1253_v20 = vcombine.low %v6213_v25, %v705_v13  ;;  %2811 = vrot.lane.b32.xlu1 %v3669_v32, %s3853_s22  ;;  %6214 = vst [vmem:[#allocation38_spill] sm:$0xff] %v4782_v10  ;;  %v4804_v32 = vrot.slane %v1704_v31, %v6212_v45  ;;  %v4807_v2 = vrot.slane %v1363_v41, %v6212_v45  ;;  %v6222_v31 = vld [vmem:[#allocation9_spill] sm:$0xff]  ;;  %v6224_v41 = vld [vmem:[#allocation8_spill] sm:$0xff] }
  0xdb   : > { %v4788_v28 = vrot.slane %v1593_v52, %v4471_v7  ;;  %2741 = vrot.lane.b32.xlu0 %v3657_v44, %s3853_s22  ;;  %v6217_v44 = vld [vmem:[#allocation2_spill] sm:$0xff]  ;;  %v4813_v8 = vrot.slane %v1703_v6, %v6212_v45  ;;  %v6223_v24 = vpack.i.b16 %v6221_v39, %v6222_v31  ;;  %v6225_v53 = vcombine.high %v6224_v41, %v6224_v41  ;;  %v6227_v25 = vld [vmem:[#allocation52_spill] sm:$0xff] }
  0xdc   : > { %v4801_v9 = vrot.slane %v1253_v20, %v4471_v7  ;;  %v292_v13 = vpop.permute.xlu1 %291  ;;  %6215 = vst [vmem:[#allocation40_spill] sm:$0xff] %v4804_v32  ;;  %6216 = vst [vmem:[#allocation50_spill] sm:$0xff] %v4807_v2  ;;  %v6219_v38 = vpack.i.b16 %v6217_v44, %v6218_v62  ;;  %v6226_v6 = vcombine.high %v4656_v48, %v4663_v33 }
  0xdd   : > { %v290_v63 = vpop.permute.xlu0 %289  ;;  %6220 = vst [vmem:[#allocation4_spill] sm:$0xff] %v4813_v8  ;;  %v1211_v27 = vcombine.low %v6223_v24, %v693_v55  ;;  %v841_v52 = vpack.i.b16 %v292_v13, %v284_v17  ;;  %v844_v55 = vshrl.u32 %v292_v13, 16  ;;  %v6228_v20 = vcombine.high %v6227_v25, %v6227_v25 }
  0xde   : > { %v1551_v43 = vcombine.low %v6219_v38, %v825_v1  ;;  %2690 = vrot.lane.b32.xlu1 %v6225_v53, %s3854_s23  ;;  %v4830_v12 = vrot.slane %v6226_v6, %v6212_v45  ;;  %v701_v1 = vpack.i.b16 %v4752_v22, %v4726_v54  ;;  %v6229_v44 = vcombine.high %v4647_v29, %v4650_v26 }
  0xdf   : > { %2620 = vrot.lane.b32.xlu0 %v6228_v20, %s3854_s23  ;;  %v712_v38 = vshrl.u32 %v290_v63, 16  ;;  %v6231_v31 = vcombine.high %v4668_v19, %v4675_v46  ;;  %v6232_v22 = vcombine.low %v4668_v19, %v4675_v46  ;;  %v6233_v24 = vcombine.high %v4638_v30, %v4641_v36 }
  0xe0   : > { %v4846_v62 = vrot.slane %v6229_v44, %v6212_v45  ;;  %v300_v39 = vpop.permute.xlu1 %299  ;;  %v4867_v6 = vrot.slane %v1551_v43, %v4471_v7  ;;  %v843_v20 = vshrl.u32 %v284_v17, 16  ;;  %v6237_v19 = vcombine.low %v4638_v30, %v4641_v36  ;;  %v6241_v36 = vld [vmem:[#allocation14_spill] sm:$0xff] }
  0xe1   : > { %v4852_v54 = vrot.slane %v6231_v31, %v6212_v45  ;;  %v4858_v13 = vrot.slane %v6232_v22, %v6212_v45  ;;  %v4864_v53 = vrot.slane %v6233_v24, %v6212_v45  ;;  %v298_v44 = vpop.permute.xlu0 %297  ;;  %v6235_v31 = vcombine.low %v4647_v29, %v4650_v26  ;;  %v6239_v24 = vld [vmem:[#allocation53_spill] sm:$0xff]  ;;  %v6242_v26 = vld [vmem:[#allocation11_spill] sm:$0xff] }
  0xe2   : > { %6230 = vst [vmem:[#allocation24_spill] sm:$0xff] %v4846_v62  ;;  %v4879_v46 = vrot.slane %v6237_v19, %v6212_v45  ;;  %v4882_v22 = vrot.slane %v1211_v27, %v4471_v7  ;;  %v711_v43 = vshrl.u32 %v4769_v3, 16  ;;  %v709_v17 = vpack.i.b16 %v290_v63, %v4769_v3 }
  0xe3   : > { %6234 = vst [vmem:[#allocation54_spill] sm:$0xff] %v4864_v53  ;;  %v4873_v21 = vrot.slane %v6235_v31, %v6212_v45  ;;  %v6240_v15 = vcombine.high %v6239_v24, %v6239_v24  ;;  %v3668_v29 = vcombine.low %v4772_v51, %v4830_v12  ;;  %v833_v30 = vpack.i.b16 %v4747_v47, %v4719_v16  ;;  %v6254_v47 = vld [vmem:[#allocation19_spill] sm:$0xff] }
  0xe4   : > { %6238 = vst [vmem:[#allocation15_spill] sm:$0xff] %v4879_v46  ;;  %v6243_v31 = vpack.i.b16 %v6241_v36, %v6242_v26  ;;  %v845_v19 = vpack.i.b16 %v844_v55, %v843_v20  ;;  %v6246_v25 = vpack.i.b16 %v6244_v11, %v6245_v58  ;;  %v6247_v63 = vcombine.high %v4553_v50, %v4553_v50  ;;  %v308_v41 = vpop.permute.xlu1 %307  ;;  %v6253_v58 = vld [vmem:[#allocation23_spill] sm:$0xff] }
  0xe5   : > { %6236 = vst [vmem:[#allocation7_spill] sm:$0xff] %v4873_v21  ;;  %2830 = vrot.lane.b32.xlu1 %v6240_v15, %s3854_s23  ;;  %v713_v15 = vpack.i.b16 %v712_v38, %v711_v43  ;;  %v851_v24 = vshrl.u32 %v300_v39, 16  ;;  %v852_v55 = vshrl.u32 %v308_v41, 16  ;;  %v306_v20 = vpop.permute.xlu0 %305  ;;  %v719_v36 = vshrl.u32 %v298_v44, 16 }
  0xe6   : > { %v1219_v27 = vcombine.low %v6243_v31, %v701_v1  ;;  %v1619_v3 = vcombine.low %v841_v52, %v6246_v25  ;;  %2760 = vrot.lane.b32.xlu0 %v6247_v63, %s3854_s23  ;;  %v849_v1 = vpack.i.b16 %v308_v41, %v300_v39  ;;  %v6248_v52 = vld [vmem:[#allocation17_spill] sm:$0xff]  ;;  %v717_v26 = vpack.i.b16 %v306_v20, %v298_v44  ;;  %v6252_v41 = vld [vmem:[#allocation46_spill] sm:$0xff] }
  0xe7   : > { %v6249_v25 = vld [vmem:[#allocation13_spill] sm:$0xff]  ;;  %v720_v31 = vshrl.u32 %v306_v20, 16  ;;  %v6251_v39 = vcombine.high %v6206_v61, %v6206_v61  ;;  %v1653_v63 = vcombine.low %v845_v19, %v6252_v41  ;;  %v853_v16 = vpack.i.b16 %v852_v55, %v851_v24  ;;  %v6257_v20 = vld [vmem:[#allocation47_spill] sm:$0xff]  ;;  %v6258_v61 = vld [vmem:[#allocation26_spill] sm:$0xff] }
  0xe8   : > { %v6250_v38 = vpack.i.b16 %v6248_v52, %v6249_v25  ;;  %v6255_v50 = vpack.i.b16 %v6253_v58, %v6254_v47  ;;  %v3644_v44 = vcombine.low %v4779_v14, %v4852_v54  ;;  %v1313_v52 = vcombine.low %v713_v15, %v6257_v20  ;;  %v4933_v24 = vpop.permute.xlu1 %657  ;;  %v6261_v47 = vld [vmem:[#allocation6_spill] sm:$0xff] }
  0xe9   : > { %2709 = vrot.lane.b32.xlu1 %v6251_v39, %s3855_s24  ;;  %v721_v25 = vpack.i.b16 %v720_v31, %v719_v36  ;;  %v1626_v58 = vrot.slane %v1619_v3, %v4471_v7  ;;  %v4943_v36 = vpop.permute.xlu0 %655  ;;  %v1226_v31 = vrot.slane %v1219_v27, %v4471_v7  ;;  %v1660_v3 = vrot.slane %v1653_v63, %v4471_v7 }
  0xea   : > { %v1279_v43 = vcombine.low %v709_v17, %v6250_v38  ;;  %v1627_v11 = vcombine.low %v849_v1, %v6255_v50  ;;  %v6256_v17 = vcombine.high %v4534_v42, %v4534_v42  ;;  %v6259_v38 = vld [vmem:[#allocation20_spill] sm:$0xff]  ;;  %v3632_v50 = vcombine.low %v4792_v56, %v4858_v13  ;;  %v6262_v1 = vld [vmem:[#allocation5_spill] sm:$0xff] }
  0xeb   : > { %v6260_v39 = vpack.i.b16 %v6258_v61, %v6259_v38  ;;  %v6263_v55 = vpack.i.b16 %v6261_v47, %v6262_v1  ;;  %v6265_v61 = vld [vmem:[#allocation49_spill] sm:$0xff]  ;;  %v6267_v27 = vcombine.high %v6204_v37, %v6204_v37  ;;  %v1228_v37 = vcombine.high %v4882_v22, %v1226_v31 }
  0xec   : > { %2639 = vrot.lane.b32.xlu0 %v6256_v17, %s3855_s24  ;;  %v1634_v41 = vrot.slane %v1627_v11, %v4471_v7  ;;  %v6264_v17 = vld [vmem:[#allocation48_spill] sm:$0xff]  ;;  %v1321_v38 = vcombine.low %v721_v25, %v6265_v61  ;;  %v4961_v1 = vpop.permute.xlu1 %665 }
  0xed   : > { %v1287_v19 = vcombine.low %v717_v26, %v6260_v39  ;;  %v1559_v42 = vcombine.low %v6263_v55, %v833_v30  ;;  %v1661_v15 = vcombine.low %v853_v16, %v6264_v17  ;;  %v1286_v26 = vrot.slane %v1279_v43, %v4471_v7  ;;  %v4964_v63 = vpop.permute.xlu0 %663 }
  0xee   : > { %v6266_v30 = vcombine.high %v6202_v5, %v6202_v5  ;;  %v1635_v11 = vcombine.low %v1626_v58, %v1634_v41  ;;  %v1636_v39 = vcombine.high %v1626_v58, %v1634_v41  ;;  %v1320_v43 = vrot.slane %v1313_v52, %v4471_v7 }
  0xef   : > { %v1294_v20 = vrot.slane %v1287_v19, %v4471_v7  ;;  %v1668_v16 = vrot.slane %v1661_v15, %v4471_v7  ;;  %v1328_v47 = vrot.slane %v1321_v38, %v4471_v7  ;;  %v1566_v5 = vrot.slane %v1559_v42, %v4471_v7 }
  0xf0   : > { %2849 = vrot.lane.b32.xlu1 %v6266_v30, %s3855_s24  ;;  %2779 = vrot.lane.b32.xlu0 %v6267_v27, %s3855_s24  ;;  %v3742_v55 = vcombine.high %v4782_v10, %v4846_v62  ;;  %v6268_v52 = vcombine.low %v4656_v48, %v4663_v33  ;;  %v3754_v42 = vcombine.high %v4804_v32, %v4864_v53  ;;  %v4992_v38 = vpop.permute.xlu1 %673  ;;  %v1071_v32 = vshrl.u32 %v4964_v63, 16 }
  0xf1   : > { %v1295_v19 = vcombine.low %v1286_v26, %v1294_v20  ;;  %v1296_v25 = vcombine.high %v1286_v26, %v1294_v20  ;;  %v1670_v58 = vcombine.high %v1660_v3, %v1668_v16  ;;  %v1669_v41 = vcombine.low %v1660_v3, %v1668_v16 }
  0xf2   : > { %v1813_v17 = vrot.slane %v6268_v52, %v6212_v45  ;;  %v1330_v15 = vcombine.high %v1320_v43, %v1328_v47  ;;  %v1329_v26 = vcombine.low %v1320_v43, %v1328_v47  ;;  %v6269_v20 = vcombine.high %v4785_v4, %v4788_v28  ;;  %v5012_v52 = vpop.permute.xlu0 %671 }
  0xf3   : > { %v6272_v48 = vcombine.high %v4798_v35, %v4801_v9  ;;  %v6273_v30 = vcombine.low %v4798_v35, %v4801_v9  ;;  %v5007_v27 = vrot.slane %v1296_v25, %v6212_v45  ;;  %v1567_v43 = vcombine.low %v4867_v6, %v1566_v5  ;;  %v6293_v35 = vld [vmem:[#allocation29_spill] sm:$0xff] }
  0xf4   : > { %2809 = vrot.lane.b32.xlu1 %v3668_v29, %s3853_s22  ;;  %2669 = vrot.lane.b32.xlu0 %v3644_v44, %s3853_s22  ;;  %v4981_v61 = vrot.slane %v6269_v20, %v6212_v45  ;;  %v4984_v29 = vrot.slane %v1670_v58, %v6212_v45  ;;  %v4995_v44 = vrot.slane %v1330_v15, %v6212_v45 }
  0xf5   : > { %v4990_v33 = vrot.slane %v6272_v48, %v6212_v45  ;;  %v5001_v3 = vrot.slane %v6273_v30, %v6212_v45  ;;  %v5004_v16 = vrot.slane %v1329_v26, %v6212_v45  ;;  %6274 = vst [vmem:[#allocation44_spill] sm:$0xff] %v5007_v27  ;;  %v1568_v47 = vcombine.high %v4867_v6, %v1566_v5  ;;  %v5042_v26 = vpop.permute.xlu1 %681 }
  0xf6   : > { %6270 = vst [vmem:[#allocation42_spill] sm:$0xff] %v4981_v61  ;;  %6271 = vst [vmem:[#allocation43_spill] sm:$0xff] %v4984_v29  ;;  %v1227_v58 = vcombine.low %v4882_v22, %v1226_v31  ;;  %v3667_v15 = vcombine.low %v4981_v61, %v4984_v29  ;;  %v5022_v25 = vrot.slane %v1228_v37, %v6212_v45  ;;  %v1203_v29 = vshrl.u32 %v4961_v1, 16 }
  0xf7   : > { %v6276_v6 = vcombine.low %v4785_v4, %v4788_v28  ;;  %v5032_v31 = vrot.slane %v1669_v41, %v6212_v45  ;;  %v5035_v5 = vrot.slane %v1636_v39, %v6212_v45  ;;  %v5040_v37 = vrot.slane %v1295_v19, %v6212_v45  ;;  %v5053_v41 = vpop.permute.xlu0 %679  ;;  %v6290_v4 = vld [vmem:[#allocation22_spill] sm:$0xff]  ;;  %v6291_v19 = vld [vmem:[#allocation25_spill] sm:$0xff] }
  0xf8   : > { %2688 = vrot.lane.b32.xlu1 %v3742_v55, %s3854_s23  ;;  %6275 = vst [vmem:[#allocation45_spill] sm:$0xff] %v5022_v25  ;;  %2599 = vrot.lane.b32.xlu0 %v3632_v50, %s3853_s22  ;;  %v5047_v28 = vrot.slane %v1635_v11, %v6212_v45  ;;  %v3656_v20 = vcombine.low %v4795_v34, %v1813_v17  ;;  %v1039_v55 = vshrl.u32 %v6290_v4, 16  ;;  %v1172_v9 = vshrl.u32 %v6291_v19, 16 }
  0xf9   : > { %v5028_v22 = vrot.slane %v6276_v6, %v6212_v45  ;;  %6277 = vst [vmem:[#allocation2_spill] sm:$0xff] %v5035_v5  ;;  %6278 = vst [vmem:[#allocation3_spill] sm:$0xff] %v5040_v37  ;;  %v5059_v48 = vrot.slane %v1568_v47, %v6212_v45  ;;  %v5063_v11 = vrot.slane %v1227_v58, %v6212_v45  ;;  %v5073_v50 = vpop.permute.xlu1 %498  ;;  %v1077_v62 = vshrl.u32 %v5053_v41, 16 }
  0xfa   : > { %6279 = vst [vmem:[#allocation10_spill] sm:$0xff] %v5047_v28  ;;  %v5066_v30 = vrot.slane %v1567_v43, %v6212_v45  ;;  %6283 = vst [vmem:[#allocation16_spill] sm:$0xff] %v5073_v50  ;;  %v3745_v47 = vcombine.high %v4779_v14, %v4852_v54  ;;  %v3757_v14 = vcombine.high %v4772_v51, %v4830_v12  ;;  %v6289_v51 = vld [vmem:[#allocation21_spill] sm:$0xff]  ;;  %v1208_v61 = vshrl.u32 %v4992_v38, 16 }
  0xfb   : > { %6280 = vst [vmem:[#allocation9_spill] sm:$0xff] %v5059_v48  ;;  %6281 = vst [vmem:[#allocation14_spill] sm:$0xff] %v5063_v11  ;;  %v5081_v58 = vpop.permute.xlu0 %496  ;;  %v1171_v12 = vshrl.u32 %v6289_v51, 16  ;;  %v1069_v50 = vpack.i.b16 %v4964_v63, %v4943_v36 }
  0xfc   : > { %2828 = vrot.lane.b32.xlu1 %v3754_v42, %s3854_s23  ;;  %6282 = vst [vmem:[#allocation11_spill] sm:$0xff] %v5066_v30  ;;  %2739 = vrot.lane.b32.xlu0 %v3656_v20, %s3853_s22  ;;  %6284 = vst [vmem:[#allocation12_spill] sm:$0xff] %v5081_v58  ;;  %v3736_v20 = vcombine.high %v4807_v2, %v4873_v21  ;;  %v3748_v42 = vcombine.high %v4813_v8, %v4879_v46  ;;  %v1179_v21 = vshrl.u32 %v6293_v35, 16 }
  0xfd   : > { %v5087_v39 = vpop.permute.xlu1 %506  ;;  %v1209_v2 = vshrl.u32 %v5042_v26, 16  ;;  %v1076_v30 = vshrl.u32 %v5012_v52, 16 }
  0xfe   : > { %6285 = vst [vmem:[#allocation17_spill] sm:$0xff] %v5087_v39 }
  0xff   : > { %v5091_v54 = vpop.permute.xlu0 %504  ;;  %v1210_v28 = vpack.i.b16 %v1209_v2, %v1208_v61  ;;  %v5149_v61 = vpack.i.b16 %v1172_v9, %v1171_v12  ;;  %v1201_v9 = vpack.i.b16 %v4961_v1, %v4933_v24  ;;  %v6310_v12 = vshrl.u32 %v6179_v57, 16  ;;  %v5209_v57 = vld [vmem:[%s3901_s19 + $0x8] sm:$0xf] }
 0x100   : > { %2707 = vrot.lane.b32.xlu1 %v3745_v47, %s3855_s24  ;;  %2618 = vrot.lane.b32.xlu0 %v3736_v20, %s3854_s23  ;;  %6286 = vst [vmem:[#allocation13_spill] sm:$0xff] %v5091_v54  ;;  %v3751_v47 = vcombine.high %v4795_v34, %v1813_v17  ;;  %v3739_v20 = vcombine.high %v4792_v56, %v4858_v13  ;;  %v6294_v34 = vld [vmem:[#allocation28_spill] sm:$0xff]  ;;  %v6296_v56 = vld [vmem:[#allocation31_spill] sm:$0xff]  ;;  %v1070_v54 = vshrl.u32 %v4943_v36, 16  ;;  %6315 = vst [vmem:[#allocation48_spill] sm:$0xff] %v5209_v57 }
 0x101   : > { %v5097_v43 = vpop.permute.xlu1 %514  ;;  %v1047_v17 = vshrl.u32 %v6294_v34, 16  ;;  %v1180_v13 = vshrl.u32 %v6296_v56, 16 }
 0x102   : > { %6287 = vst [vmem:[#allocation46_spill] sm:$0xff] %v5097_v43  ;;  %v1078_v43 = vpack.i.b16 %v1077_v62, %v1076_v30  ;;  %v1207_v62 = vpack.i.b16 %v5042_v26, %v4992_v38 }
 0x103   : > { %v5100_v6 = vpop.permute.xlu0 %512  ;;  %v5176_v26 = vpack.i.b16 %v1180_v13, %v1179_v21  ;;  %v6311_v21 = vshrl.u32 %v6185_v59, 16  ;;  %v2170_v13 = vrot.slane %v1069_v50, %v4471_v7  ;;  %v2510_v50 = vrot.slane %v1201_v9, %v4471_v7 }
 0x104   : > { %2847 = vrot.lane.b32.xlu1 %v3757_v14, %s3855_s24  ;;  %2758 = vrot.lane.b32.xlu0 %v3748_v42, %s3854_s23  ;;  %6288 = vst [vmem:[#allocation23_spill] sm:$0xff] %v5100_v6  ;;  %v6292_v42 = vld [vmem:[#allocation27_spill] sm:$0xff]  ;;  %v6304_v6 = vcombine.low %v4990_v33, %v4995_v44  ;;  %v2212_v38 = vrot.slane %v1078_v43, %v4471_v7 }
 0x105   : > { %v1040_v14 = vshrl.u32 %v6292_v42, 16  ;;  %v5113_v46 = vpop.permute.xlu1 %522  ;;  %v3735_v9 = vcombine.high %v5063_v11, %v5040_v37  ;;  %v6333_v37 = vld [vmem:[#allocation10_spill] sm:$0xff]  ;;  %v6334_v11 = vld [vmem:[#allocation11_spill] sm:$0xff] }
 0x106   : > { %6295 = vst [vmem:[#allocation19_spill] sm:$0xff] %v5113_v46  ;;  %v1075_v46 = vpack.i.b16 %v5053_v41, %v5012_v52  ;;  %v2552_v41 = vrot.slane %v1210_v28, %v4471_v7 }
 0x107   : > { %v5119_v10 = vpop.permute.xlu0 %520  ;;  %v5161_v52 = vpack.i.b16 %v1040_v14, %v1039_v55  ;;  %v5196_v14 = vpack.i.b16 %v6311_v21, %v6310_v12 }
 0x108   : > { %2777 = vrot.lane.b32.xlu1 %v3751_v47, %s3855_s24  ;;  %2637 = vrot.lane.b32.xlu0 %v3739_v20, %s3855_s24  ;;  %v6297_v47 = vld [vmem:[#allocation30_spill] sm:$0xff]  ;;  %6299 = vst [vmem:[#allocation47_spill] sm:$0xff] %v5119_v10  ;;  %v1202_v20 = vshrl.u32 %v4933_v24, 16  ;;  %v2178_v63 = vrot.slane %v1075_v46, %v4471_v7  ;;  %v6332_v10 = vld [vmem:[#allocation17_spill] sm:$0xff] }
 0x109   : > { %v1048_v8 = vshrl.u32 %v6297_v47, 16  ;;  %v5136_v39 = vpop.permute.xlu1 %530  ;;  %v5188_v46 = vld [vmem:[%s3901_s19 + $0x20] sm:$0xf]  ;;  %6312 = vst [vmem:[#allocation6_spill] sm:$0xff] %v5196_v14  ;;  %v1140_v24 = vshrl.u32 %v6332_v10, 16 }
 0x10a   : > { %6309 = vst [vmem:[#allocation20_spill] sm:$0xff] %v5188_v46  ;;  %v2180_v21 = vcombine.high %v2170_v13, %v2178_v63  ;;  %v2179_v59 = vcombine.low %v2170_v13, %v2178_v63  ;;  %v5248_v63 = vld [vmem:[%s3901_s19 + $0x44] sm:$0xf] }
 0x10b   : > { %v5144_v53 = vpop.permute.xlu0 %528  ;;  %v5182_v28 = vpack.i.b16 %v1048_v8, %v1047_v17  ;;  %v2518_v8 = vrot.slane %v1207_v62, %v4471_v7  ;;  %v6313_v17 = vcombine.low %v5028_v22, %v5032_v31  ;;  %6326 = vst [vmem:[#allocation29_spill] sm:$0xff] %v5248_v63 }
 0x10c   : > { %2807 = vrot.lane.b32.xlu1 %v3667_v15, %s3853_s22  ;;  %2667 = vrot.lane.b32.xlu0 %v6304_v6, %s3853_s22  ;;  %v3741_v15 = vcombine.high %v5022_v25, %v5007_v27  ;;  %v1204_v6 = vpack.i.b16 %v1203_v29, %v1202_v20  ;;  %v1072_v27 = vpack.i.b16 %v1071_v32, %v1070_v54  ;;  %v5185_v54 = vld [vmem:[%s3901_s19 + $0xc] sm:$0xf] }
 0x10d   : > { %v6307_v29 = vcombine.low %v5001_v3, %v5004_v16  ;;  %v5166_v30 = vpop.permute.xlu1 %538  ;;  %v3753_v32 = vcombine.high %v5059_v48, %v5035_v5  ;;  %6308 = vst [vmem:[#allocation26_spill] sm:$0xff] %v5185_v54  ;;  %v2520_v13 = vcombine.high %v2510_v50, %v2518_v8  ;;  %v6335_v5 = vld [vmem:[#allocation51_spill] sm:$0xff] }
 0x10e   : > { %v2544_v1 = vrot.slane %v1204_v6, %v4471_v7  ;;  %v2204_v20 = vrot.slane %v1072_v27, %v4471_v7  ;;  %v6340_v48 = vld [vmem:[#allocation43_spill] sm:$0xff]  ;;  %v5290_v25 = vrot.slane %v2179_v59, %v6335_v5 }
 0x10f   : > { %v5174_v55 = vpop.permute.xlu0 %536 }
 0x110   : > { %2686 = vrot.lane.b32.xlu1 %v3741_v15, %s3854_s23  ;;  %2597 = vrot.lane.b32.xlu0 %v6307_v29, %s3853_s22  ;;  %v5206_v15 = vld [vmem:[%s3901_s19 + $0x1c] sm:$0xf]  ;;  %v2553_v27 = vcombine.low %v2544_v1, %v2552_v41  ;;  %v2554_v6 = vcombine.high %v2544_v1, %v2552_v41  ;;  %v6316_v29 = vshrl.u32 %v6180_v23, 16  ;;  %v2214_v43 = vcombine.high %v2204_v20, %v2212_v38  ;;  %v5231_v1 = vld [vmem:[%s3901_s19 + $0x34] sm:$0xf] }
 0x111   : > { %6314 = vst [vmem:[#allocation5_spill] sm:$0xff] %v5206_v15  ;;  %v5214_v62 = vpop.permute.xlu1 %546  ;;  %v6319_v41 = vcombine.high %v4990_v33, %v4995_v44  ;;  %6320 = vst [vmem:[#allocation21_spill] sm:$0xff] %v5231_v1  ;;  %v5234_v23 = vld [vmem:[%s3901_s19 + $0x48] sm:$0xf]  ;;  %v2519_v44 = vcombine.low %v2510_v50, %v2518_v8  ;;  %v3747_v33 = vcombine.high %v6334_v11, %v6333_v37  ;;  %v6338_v37 = vld [vmem:[#allocation16_spill] sm:$0xff] }
 0x112   : > { %6321 = vst [vmem:[#allocation22_spill] sm:$0xff] %v5234_v23  ;;  %v5267_v8 = vrot.slane %v2554_v6, %v6335_v5  ;;  %v5270_v50 = vrot.slane %v2553_v27, %v6335_v5  ;;  %v1139_v11 = vshrl.u32 %v6338_v37, 16  ;;  %v6339_v6 = vld [vmem:[#allocation42_spill] sm:$0xff]  ;;  %v6347_v23 = vld [vmem:[#allocation12_spill] sm:$0xff]  ;;  %v1163_v54 = vshrl.u32 %v5214_v62, 16 }
 0x113   : > { %v5222_v2 = vpop.permute.xlu0 %544  ;;  %v6341_v27 = vcombine.high %v6339_v6, %v6340_v48  ;;  %v5305_v48 = vrot.slane %v2520_v13, %v6335_v5  ;;  %v5308_v59 = vrot.slane %v2519_v44, %v6335_v5 }
 0x114   : > { %2826 = vrot.lane.b32.xlu1 %v3753_v32, %s3854_s23  ;;  %2737 = vrot.lane.b32.xlu0 %v6313_v17, %s3853_s22  ;;  %v6317_v32 = vshrl.u32 %v6186_v49, 16  ;;  %v2213_v17 = vcombine.low %v2204_v20, %v2212_v38  ;;  %v6322_v38 = vshrl.u32 %v4116_v60, 16  ;;  %v6323_v20 = vshrl.u32 %v6203_v0, 16  ;;  %v6330_v0 = vld [vmem:[#allocation32_spill] sm:$0xff]  ;;  %6336 = vst [vmem:[#allocation31_spill] sm:$0xff] %v5270_v50 }
 0x115   : > { %v6328_v49 = vshrl.u32 %v6205_v40, 16  ;;  %v5262_v36 = vpop.permute.xlu1 %554  ;;  %v5310_v6 = vpack.i.b16 %v1140_v24, %v1139_v11  ;;  %v6351_v24 = vcombine.high %v5001_v3, %v5004_v16  ;;  %v6352_v16 = vld [vmem:[#allocation19_spill] sm:$0xff]  ;;  %v1031_v46 = vshrl.u32 %v5222_v2, 16 }
 0x116   : > { %v5220_v12 = vpack.i.b16 %v6317_v32, %v6316_v29  ;;  %v5242_v29 = vpack.i.b16 %v6323_v20, %v6322_v38  ;;  %v5245_v32 = vld [vmem:[%s3901_s19 + $0x30] sm:$0xf]  ;;  %v6331_v38 = vld [vmem:[#allocation34_spill] sm:$0xff]  ;;  %v5282_v20 = vrot.slane %v2180_v21, %v6335_v5  ;;  %v1021_v21 = vpack.i.b16 %v5174_v55, %v5144_v53 }
 0x117   : > { %6325 = vst [vmem:[#allocation27_spill] sm:$0xff] %v5245_v32  ;;  %v6342_v32 = vshrl.u32 %v6330_v0, 16 }
 0x118   : > { %6318 = vst [vmem:[#allocation49_spill] sm:$0xff] %v5220_v12  ;;  %2705 = vrot.lane.b32.xlu1 %v6319_v41, %s3855_s24  ;;  %6324 = vst [vmem:[#allocation25_spill] sm:$0xff] %v5242_v29  ;;  %2616 = vrot.lane.b32.xlu0 %v3735_v9, %s3854_s23  ;;  %v6327_v41 = vshrl.u32 %v3937_v18, 16  ;;  %v6337_v18 = vld [vmem:[#allocation13_spill] sm:$0xff]  ;;  %v5273_v9 = vpop.permute.xlu0 %552  ;;  %v1137_v29 = vpack.i.b16 %v6332_v10, %v6338_v37  ;;  %v3705_v10 = vcombine.low %v5270_v50, %v5270_v50 }
 0x119   : > { %v1008_v40 = vshrl.u32 %v6337_v18, 16  ;;  %v1153_v12 = vpack.i.b16 %v5166_v30, %v5136_v39 }
 0x11a   : > { %v5257_v60 = vpack.i.b16 %v6328_v49, %v6327_v41  ;;  %v5276_v49 = vrot.slane %v2214_v43, %v6335_v5  ;;  %v5279_v41 = vrot.slane %v2213_v17, %v6335_v5  ;;  %v6343_v43 = vshrl.u32 %v6331_v38, 16  ;;  %v6345_v17 = vld [vmem:[#allocation33_spill] sm:$0xff]  ;;  %v6353_v38 = vld [vmem:[#allocation47_spill] sm:$0xff] }
 0x11b   : > { %v1016_v45 = vshrl.u32 %v6353_v38, 16  ;;  %v2367_v1 = vcombine.low %v1137_v29, %v1153_v12 }
 0x11c   : > { %6329 = vst [vmem:[#allocation28_spill] sm:$0xff] %v5257_v60  ;;  %2845 = vrot.lane.b32.xlu1 %v6341_v27, %s3855_s24  ;;  %v5296_v63 = vpack.i.b16 %v6343_v43, %v6342_v32  ;;  %v1007_v60 = vshrl.u32 %v6347_v23, 16  ;;  %2756 = vrot.lane.b32.xlu0 %v3747_v33, %s3854_s23  ;;  %v1005_v32 = vpack.i.b16 %v6337_v18, %v6347_v23  ;;  %v5314_v27 = vpop.permute.xlu1 %625  ;;  %v5322_v33 = vpop.permute.xlu0 %623  ;;  %v6348_v23 = vld [vmem:[#allocation46_spill] sm:$0xff]  ;;  %v1156_v18 = vshrl.u32 %v5166_v30, 16 }
 0x11d   : > { %v3717_v43 = vcombine.low %v5267_v8, %v5267_v8  ;;  %v3693_v44 = vcombine.low %v5276_v49, %v5276_v49  ;;  %v3681_v11 = vcombine.low %v5279_v41, %v5279_v41  ;;  %v1147_v13 = vshrl.u32 %v6348_v23, 16 }
 0x11e   : > { %6344 = vst [vmem:[#allocation30_spill] sm:$0xff] %v5296_v63  ;;  %v5320_v37 = vpack.i.b16 %v1008_v40, %v1007_v60  ;;  %v6349_v60 = vcombine.high %v5028_v22, %v5032_v31  ;;  %v6350_v63 = vld [vmem:[#allocation23_spill] sm:$0xff]  ;;  %v1155_v31 = vshrl.u32 %v5136_v39, 16  ;;  %v1032_v40 = vshrl.u32 %v5273_v9, 16 }
 0x11f   : > { %v1015_v0 = vshrl.u32 %v6350_v63, 16  ;;  %v1024_v22 = vshrl.u32 %v5174_v55, 16  ;;  %v2027_v14 = vcombine.low %v1005_v32, %v1021_v21  ;;  %v1145_v3 = vpack.i.b16 %v6352_v16, %v6348_v23 }
 0x120   : > { %2775 = vrot.lane.b32.xlu1 %v6349_v60, %s3855_s24  ;;  %2635 = vrot.lane.b32.xlu0 %v6351_v24, %s3855_s24  ;;  %v1164_v60 = vshrl.u32 %v5262_v36, 16  ;;  %v5354_v58 = vpop.permute.xlu1 %633  ;;  %v1148_v24 = vshrl.u32 %v6352_v16, 16  ;;  %v632_v57 = vpop.permute.xlu0 %631  ;;  %v1157_v15 = vpack.i.b16 %v1156_v18, %v1155_v31  ;;  %v1013_v5 = vpack.i.b16 %v6353_v38, %v6350_v63 }
 0x121   : > { %v1029_v39 = vpack.i.b16 %v5273_v9, %v5222_v2  ;;  %v1188_v30 = vshrl.u32 %v5354_v58, 16  ;;  %v1023_v55 = vshrl.u32 %v5144_v53, 16  ;;  %v1033_v32 = vpack.i.b16 %v1032_v40, %v1031_v46 }
 0x122   : > { %v1165_v21 = vpack.i.b16 %v1164_v60, %v1163_v54  ;;  %v1056_v18 = vshrl.u32 %v632_v57, 16  ;;  %v1017_v50 = vpack.i.b16 %v1016_v45, %v1015_v0  ;;  %v1187_v23 = vshrl.u32 %v5314_v27, 16  ;;  %v6354_v45 = vld [vmem:[#allocation41_spill] sm:$0xff] }
 0x123   : > { %v2401_v63 = vcombine.low %v5310_v6, %v1157_v15  ;;  %v1025_v38 = vpack.i.b16 %v1024_v22, %v1023_v55  ;;  %v5378_v2 = vrot.slane %v2027_v14, %v4471_v7  ;;  %v1055_v9 = vshrl.u32 %v5322_v33, 16 }
 0x124   : > { %2951 = vrot.lane.b32.xlu1 %v3693_v44, %s3853_s22  ;;  %2881 = vrot.lane.b32.xlu0 %v3681_v11, %s3853_s22  ;;  %v642_v31 = vpop.permute.xlu1 %641  ;;  %v1149_v44 = vpack.i.b16 %v1148_v24, %v1147_v13  ;;  %v640_v16 = vpop.permute.xlu0 %639  ;;  %v1161_v53 = vpack.i.b16 %v5262_v36, %v5214_v62  ;;  %v2035_v54 = vcombine.low %v1013_v5, %v1029_v39  ;;  %v1000_v12 = vshrl.u32 %v6354_v45, 16 }
 0x125   : > { %v1189_v46 = vpack.i.b16 %v1188_v30, %v1187_v23  ;;  %v2069_v0 = vcombine.low %v1017_v50, %v1033_v32  ;;  %v1057_v15 = vpack.i.b16 %v1056_v18, %v1055_v9  ;;  %v3856_v11 = vmov 0  }
 0x126   : > { %v2409_v29 = vcombine.low %v1149_v44, %v1165_v21  ;;  %3378 = vmatprep.mubr.bf16.mxu0 %v3856_v11  ;;  %3419 = vmatprep.mubr.bf16.mxu1 %v3856_v11  ;;  %v1053_v14 = vpack.i.b16 %v632_v57, %v5322_v33  ;;  %v1185_v62 = vpack.i.b16 %v5354_v58, %v5314_v27 }
 0x127   : > { %3816 = vset.pattern.permute.xlu0 %v3856_v11  ;;  %v6355_v22 = vcombine.high %v5282_v20, %v5282_v20  ;;  %v2061_v60 = vcombine.low %v5320_v37, %v1025_v38  ;;  %v2375_v57 = vcombine.low %v1145_v3, %v1161_v53  ;;  %v2469_v33 = vcombine.low %v5149_v61, %v1189_v46 }
 0x128   : > { %3091 = vrot.lane.b32.xlu1 %v3717_v43, %s3853_s22  ;;  %3021 = vrot.lane.b32.xlu0 %v3705_v10, %s3853_s22  ;;  %v650_v6 = vpop.permute.xlu1 %649  ;;  %v1195_v43 = vshrl.u32 %v642_v31, 16  ;;  %v648_v5 = vpop.permute.xlu0 %647  ;;  %v1063_v10 = vshrl.u32 %v640_v16, 16  ;;  %v6356_v39 = vcombine.high %v5290_v25, %v5290_v25  ;;  %v2129_v58 = vcombine.low %v5161_v52, %v1057_v15 }
 0x129   : > { %v1193_v13 = vpack.i.b16 %v650_v6, %v642_v31  ;;  %v1196_v36 = vshrl.u32 %v650_v6, 16  ;;  %v1061_v50 = vpack.i.b16 %v648_v5, %v640_v16  ;;  %v1064_v40 = vshrl.u32 %v648_v5, 16 }
 0x12a   : > { %v6357_v27 = vpack.i.b16 %v6296_v56, %v6293_v35  ;;  %v6358_v21 = vpack.i.b16 %v6297_v47, %v6294_v34  ;;  %v5412_v61 = vrot.slane %v2401_v63, %v4471_v7  ;;  %v5415_v32 = vrot.slane %v2035_v54, %v4471_v7 }
 0x12b   : > { %v1197_v24 = vpack.i.b16 %v1196_v36, %v1195_v43  ;;  %v1065_v55 = vpack.i.b16 %v1064_v40, %v1063_v10  ;;  %v6359_v52 = vpack.i.b16 %v6292_v42, %v6290_v4  ;;  %v5424_v31 = vrot.slane %v2409_v29, %v4471_v7  ;;  %v6366_v40 = vld [vmem:[#allocation35_spill] sm:$0xff] }
 0x12c   : > { %2970 = vrot.lane.b32.xlu1 %v6355_v22, %s3854_s23  ;;  %2900 = vrot.lane.b32.xlu0 %v6356_v39, %s3854_s23  ;;  %v2443_v30 = vcombine.low %v6357_v27, %v1193_v13  ;;  %v2103_v37 = vcombine.low %v6358_v21, %v1061_v50  ;;  %v5409_v3 = vpop.permute.xlu1 %255  ;;  %v5421_v56 = vpop.permute.xlu0 %253  ;;  %v5427_v34 = vrot.slane %v2069_v0, %v4471_v7  ;;  %v6365_v50 = vshrl.u32 %v6345_v17, 16 }
 0x12d   : > { %v2095_v18 = vcombine.low %v6359_v52, %v1053_v14  ;;  %v2477_v35 = vcombine.low %v5176_v26, %v1197_v24  ;;  %v6360_v47 = vpack.i.b16 %v6291_v19, %v6289_v51  ;;  %v2137_v23 = vcombine.low %v5182_v28, %v1065_v55  ;;  %v6368_v24 = vld [vmem:[#allocation31_spill] sm:$0xff] }
 0x12e   : > { %v6361_v4 = vcombine.high %v5305_v48, %v5305_v48  ;;  %v5438_v42 = vrot.slane %v2375_v57, %v4471_v7  ;;  %v5441_v26 = vrot.slane %v2469_v33, %v4471_v7  ;;  %v2110_v63 = vrot.slane %v2103_v37, %v4471_v7 }
 0x12f   : > { %v2435_v44 = vcombine.low %v6360_v47, %v1185_v62  ;;  %v5444_v16 = vrot.slane %v2477_v35, %v4471_v7  ;;  %v6362_v19 = vcombine.high %v5308_v59, %v5308_v59  ;;  %v2068_v51 = vrot.slane %v2061_v60, %v4471_v7 }
 0x130   : > { %3110 = vrot.lane.b32.xlu1 %v6361_v4, %s3854_s23  ;;  %v2136_v28 = vrot.slane %v2129_v58, %v4471_v7  ;;  %v2450_v38 = vrot.slane %v2443_v30, %v4471_v7  ;;  %v2144_v9 = vrot.slane %v2137_v23, %v4471_v7  ;;  %v264_v53 = vpop.permute.xlu1 %263  ;;  %v5456_v54 = vrot.slane %v2367_v1, %v4471_v7  ;;  %v5463_v15 = vpop.permute.xlu0 %261 }
 0x131   : > { %3040 = vrot.lane.b32.xlu0 %v6362_v19, %s3854_s23  ;;  %v2044_v46 = vcombine.high %v5378_v2, %v5415_v32  ;;  %v2102_v29 = vrot.slane %v2095_v18, %v4471_v7  ;;  %v2486_v0 = vcombine.high %v5441_v26, %v5444_v16  ;;  %v2418_v6 = vcombine.high %v5412_v61, %v5424_v31 }
 0x132   : > { %v2442_v14 = vrot.slane %v2435_v44, %v4471_v7  ;;  %v2146_v43 = vcombine.high %v2136_v28, %v2144_v9  ;;  %v6363_v1 = vcombine.high %v5276_v49, %v5276_v49  ;;  %v2078_v13 = vcombine.high %v2068_v51, %v5427_v34 }
 0x133   : > { %v2384_v36 = vcombine.high %v5456_v54, %v5438_v42  ;;  %v2112_v5 = vcombine.high %v2102_v29, %v2110_v63  ;;  %v6364_v62 = vcombine.high %v5279_v41, %v5279_v41  ;;  %v3782_v10 = vcombine.high %v5267_v8, %v5267_v8  ;;  %v6369_v41 = vld [vmem:[#allocation51_spill] sm:$0xff] }
 0x134   : > { %2989 = vrot.lane.b32.xlu1 %v6363_v1, %s3855_s24  ;;  %v6367_v22 = vshrl.u32 %v6366_v40, 16  ;;  %v2383_v60 = vcombine.low %v5456_v54, %v5438_v42  ;;  %v2452_v57 = vcombine.high %v2442_v14, %v2450_v38  ;;  %v5489_v33 = vpop.permute.xlu1 %271  ;;  %v3776_v39 = vcombine.high %v6368_v24, %v6368_v24  ;;  %v5500_v55 = vpop.permute.xlu0 %269 }
 0x135   : > { %2919 = vrot.lane.b32.xlu0 %v6364_v62, %s3855_s24  ;;  %v5494_v58 = vrot.slane %v2486_v0, %v6369_v41  ;;  %v2417_v8 = vcombine.low %v5412_v61, %v5424_v31  ;;  %v2043_v27 = vcombine.low %v5378_v2, %v5415_v32  ;;  %v2145_v30 = vcombine.low %v2136_v28, %v2144_v9 }
 0x136   : > { %v5485_v49 = vpack.i.b16 %v6367_v22, %v6365_v50  ;;  %v5503_v21 = vrot.slane %v2146_v43, %v6369_v41  ;;  %v5507_v37 = vrot.slane %v2418_v6, %v6369_v41  ;;  %v5510_v52 = vrot.slane %v2078_v13, %v6369_v41  ;;  %v6371_v43 = vld [vmem:[#allocation26_spill] sm:$0xff] }
 0x137   : > { %v5513_v18 = vrot.slane %v2044_v46, %v6369_v41  ;;  %v2077_v61 = vcombine.low %v2068_v51, %v5427_v34  ;;  %v2111_v2 = vcombine.low %v2102_v29, %v2110_v63  ;;  %v1092_v32 = vshrl.u32 %v264_v53, 16 }
 0x138   : > { %3129 = vrot.lane.b32.xlu1 %v3782_v10, %s3855_s24  ;;  %v5518_v35 = vrot.slane %v2112_v5, %v6369_v41  ;;  %v5521_v31 = vrot.slane %v2384_v36, %v6369_v41  ;;  %v2451_v47 = vcombine.low %v2442_v14, %v2450_v38  ;;  %v1091_v44 = vshrl.u32 %v5409_v3, 16  ;;  %v5524_v23 = vpop.permute.xlu1 %279  ;;  %v5534_v19 = vpop.permute.xlu0 %277 }
 0x139   : > { %3059 = vrot.lane.b32.xlu0 %v3776_v39, %s3855_s24  ;;  %v3716_v4 = vcombine.low %v5507_v37, %v5494_v58  ;;  %v5529_v34 = vrot.slane %v2452_v57, %v6369_v41  ;;  %v2485_v42 = vcombine.low %v5441_v26, %v5444_v16  ;;  %v1089_v63 = vpack.i.b16 %v264_v53, %v5409_v3  ;;  %v6373_v39 = vld [vmem:[#allocation6_spill] sm:$0xff] }
 0x13a   : > { %v3692_v51 = vcombine.low %v5510_v52, %v5503_v21  ;;  %v5539_v28 = vrot.slane %v2145_v30, %v6369_v41  ;;  %v959_v38 = vshrl.u32 %v5421_v56, 16  ;;  %v960_v9 = vshrl.u32 %v5463_v15, 16  ;;  %v6374_v30 = vld [vmem:[#allocation5_spill] sm:$0xff] }
 0x13b   : > { %v5545_v54 = vrot.slane %v2077_v61, %v6369_v41  ;;  %v5548_v26 = vrot.slane %v2043_v27, %v6369_v41  ;;  %v1093_v3 = vpack.i.b16 %v1092_v32, %v1091_v44  ;;  %v957_v16 = vpack.i.b16 %v5463_v15, %v5421_v56  ;;  %v6370_v15 = vld [vmem:[#allocation20_spill] sm:$0xff] }
 0x13c   : > { %3089 = vrot.lane.b32.xlu1 %v3716_v4, %s3853_s22  ;;  %v3766_v53 = vcombine.high %v5513_v18, %v5518_v35  ;;  %v5556_v46 = vrot.slane %v2111_v2, %v6369_v41  ;;  %v1100_v29 = vshrl.u32 %v5524_v23, 16  ;;  %v968_v0 = vshrl.u32 %v5534_v19, 16  ;;  %v5560_v6 = vpop.permute.xlu1 %287  ;;  %v5570_v36 = vpop.permute.xlu0 %285  ;;  %v6375_v61 = vld [vmem:[#allocation48_spill] sm:$0xff] }
 0x13d   : > { %2949 = vrot.lane.b32.xlu0 %v3692_v51, %s3853_s22  ;;  %v5563_v14 = vrot.slane %v2451_v47, %v6369_v41  ;;  %v3713_v56 = vcombine.low %v5521_v31, %v5529_v34  ;;  %v6372_v1 = vpack.i.b16 %v6370_v15, %v6371_v43  ;;  %v3680_v5 = vcombine.low %v5545_v54, %v5539_v28 }
 0x13e   : > { %v5575_v62 = vrot.slane %v2485_v42, %v6369_v41  ;;  %v5578_v10 = vrot.slane %v2383_v60, %v6369_v41  ;;  %v961_v50 = vpack.i.b16 %v960_v9, %v959_v38  ;;  %v1099_v22 = vshrl.u32 %v5489_v33, 16 }
 0x13f   : > { %v2231_v13 = vcombine.low %v6372_v1, %v1089_v63  ;;  %v967_v57 = vshrl.u32 %v5500_v55, 16  ;;  %v3689_v24 = vcombine.low %v5513_v18, %v5518_v35  ;;  %v2265_v27 = vcombine.low %v6373_v39, %v1093_v3  ;;  %v6377_v3 = vld [vmem:[#allocation36_spill] sm:$0xff] }
 0x140   : > { %2968 = vrot.lane.b32.xlu1 %v3766_v53, %s3854_s23  ;;  %v6376_v2 = vpack.i.b16 %v6374_v30, %v6375_v61  ;;  %v5591_v60 = vrot.slane %v2417_v8, %v6369_v41  ;;  %v3677_v47 = vcombine.low %v5548_v26, %v5556_v46  ;;  %v1101_v44 = vpack.i.b16 %v1100_v29, %v1099_v22  ;;  %v296_v42 = vpop.permute.xlu1 %295  ;;  %v294_v38 = vpop.permute.xlu0 %293 }
 0x141   : > { %2879 = vrot.lane.b32.xlu0 %v3680_v5, %s3853_s22  ;;  %v969_v4 = vpack.i.b16 %v968_v0, %v967_v57  ;;  %v3778_v63 = vcombine.high %v5521_v31, %v5529_v34  ;;  %v3701_v51 = vcombine.low %v5578_v10, %v5563_v14  ;;  %v6379_v53 = vshrl.u32 %v6377_v3, 16  ;;  %v6381_v0 = vld [vmem:[#allocation37_spill] sm:$0xff] }
 0x142   : > { %v1891_v32 = vcombine.low %v6376_v2, %v957_v16  ;;  %v3704_v9 = vcombine.low %v5591_v60, %v5575_v62  ;;  %v6378_v16 = vld [vmem:[#allocation39_spill] sm:$0xff]  ;;  %v997_v43 = vpack.i.b16 %v6354_v45, %v6381_v0  ;;  %v5612_v1 = vrot.slane %v2231_v13, %v4471_v7  ;;  %v6382_v5 = vld [vmem:[#allocation49_spill] sm:$0xff] }
 0x143   : > { %v1129_v8 = vpack.i.b16 %v6378_v16, %v6377_v3  ;;  %v6380_v15 = vshrl.u32 %v6378_v16, 16  ;;  %v1925_v22 = vcombine.low %v6382_v5, %v961_v50  ;;  %v1097_v57 = vpack.i.b16 %v5524_v23, %v5489_v33  ;;  %v6384_v23 = vld [vmem:[#allocation25_spill] sm:$0xff] }
 0x144   : > { %3108 = vrot.lane.b32.xlu1 %v3778_v63, %s3854_s23  ;;  %v6383_v39 = vshrl.u32 %v6381_v0, 16  ;;  %v5625_v61 = vrot.slane %v1891_v32, %v4471_v7  ;;  %v965_v13 = vpack.i.b16 %v5534_v19, %v5500_v55  ;;  %v1108_v2 = vshrl.u32 %v296_v42, 16  ;;  %v6385_v63 = vld [vmem:[#allocation28_spill] sm:$0xff]  ;;  %v304_v45 = vpop.permute.xlu1 %303  ;;  %v302_v19 = vpop.permute.xlu0 %301 }
 0x145   : > { %v5607_v29 = vpack.i.b16 %v6380_v15, %v6379_v53  ;;  %v976_v3 = vshrl.u32 %v294_v38, 16  ;;  %3019 = vrot.lane.b32.xlu0 %v3704_v9, %s3853_s22  ;;  %v5631_v33 = vrot.slane %v2265_v27, %v4471_v7  ;;  %v2273_v50 = vcombine.low %v6384_v23, %v1101_v44  ;;  %v6386_v44 = vld [vmem:[#allocation22_spill] sm:$0xff]  ;;  %v6387_v15 = vld [vmem:[#allocation21_spill] sm:$0xff] }
 0x146   : > { %v5622_v30 = vpack.i.b16 %v1000_v12, %v6383_v39  ;;  %v1933_v16 = vcombine.low %v6385_v63, %v969_v4  ;;  %v3769_v12 = vcombine.high %v5510_v52, %v5503_v21  ;;  %v1107_v32 = vshrl.u32 %v5560_v6, 16  ;;  %v6389_v52 = vld [vmem:[#allocation29_spill] sm:$0xff] }
 0x147   : > { %v975_v53 = vshrl.u32 %v5570_v36, 16  ;;  %v1105_v55 = vpack.i.b16 %v296_v42, %v5560_v6  ;;  %v3760_v9 = vcombine.high %v5548_v26, %v5556_v46  ;;  %v5643_v27 = vrot.slane %v1925_v22, %v4471_v7  ;;  %v6390_v6 = vld [vmem:[#allocation27_spill] sm:$0xff] }
 0x148   : > { %v6388_v4 = vpack.i.b16 %v6386_v44, %v6387_v15  ;;  %v973_v5 = vpack.i.b16 %v294_v38, %v5570_v36  ;;  %2987 = vrot.lane.b32.xlu1 %v3769_v12, %s3855_s24  ;;  %v3781_v21 = vcombine.high %v5507_v37, %v5494_v58  ;;  %v6391_v42 = vpack.i.b16 %v6389_v52, %v6390_v6  ;;  %v312_v38 = vpop.permute.xlu1 %311 }
 0x149   : > { %v1109_v23 = vpack.i.b16 %v1108_v2, %v1107_v32  ;;  %v977_v63 = vpack.i.b16 %v976_v3, %v975_v53  ;;  %2898 = vrot.lane.b32.xlu0 %v3760_v9, %s3854_s23  ;;  %v3775_v22 = vcombine.high %v5591_v60, %v5575_v62  ;;  %v5662_v36 = vrot.slane %v1933_v16, %v4471_v7  ;;  %v6393_v2 = vld [vmem:[#allocation32_spill] sm:$0xff]  ;;  %v310_v60 = vpop.permute.xlu0 %309 }
 0x14a   : > { %v2239_v0 = vcombine.low %v6388_v4, %v1097_v57  ;;  %v1899_v39 = vcombine.low %v6391_v42, %v965_v13  ;;  %v5659_v57 = vrot.slane %v2273_v50, %v4471_v7  ;;  %v3772_v58 = vcombine.high %v5578_v10, %v5563_v14  ;;  %v6392_v13 = vld [vmem:[#allocation34_spill] sm:$0xff] }
 0x14b   : > { %v3763_v37 = vcombine.high %v5545_v54, %v5539_v28  ;;  %v6394_v3 = vpack.i.b16 %v6392_v13, %v6393_v2  ;;  %v1115_v32 = vshrl.u32 %v304_v45, 16  ;;  %v1113_v53 = vpack.i.b16 %v312_v38, %v304_v45  ;;  %v6396_v4 = vld [vmem:[#allocation30_spill] sm:$0xff] }
 0x14c   : > { %v1116_v62 = vshrl.u32 %v312_v38, 16  ;;  %v6395_v50 = vpack.i.b16 %v6366_v40, %v6345_v17  ;;  %v983_v9 = vshrl.u32 %v302_v19, 16  ;;  %v981_v44 = vpack.i.b16 %v310_v60, %v302_v19  ;;  %3127 = vrot.lane.b32.xlu1 %v3781_v21, %s3855_s24  ;;  %v5680_v40 = vpop.permute.xlu1 %2671 }
 0x14d   : > { %v2299_v12 = vcombine.low %v1105_v55, %v6394_v3  ;;  %v984_v15 = vshrl.u32 %v310_v60, 16  ;;  %v2333_v52 = vcombine.low %v1109_v23, %v6396_v4  ;;  %v1993_v28 = vcombine.low %v977_v63, %v5485_v49  ;;  %3038 = vrot.lane.b32.xlu0 %v3772_v58, %s3854_s23 }
 0x14e   : > { %v1959_v16 = vcombine.low %v973_v5, %v6395_v50  ;;  %v1117_v54 = vpack.i.b16 %v1116_v62, %v1115_v32  ;;  %v2307_v6 = vcombine.low %v1113_v53, %v1129_v8  ;;  %v2246_v45 = vrot.slane %v2239_v0, %v4471_v7  ;;  %v5687_v8 = vpop.permute.xlu0 %2601 }
 0x14f   : > { %v1906_v55 = vrot.slane %v1899_v39, %v4471_v7  ;;  %v985_v42 = vpack.i.b16 %v984_v15, %v983_v9  ;;  %v1967_v17 = vcombine.low %v981_v44, %v997_v43  ;;  %v2282_v19 = vcombine.high %v5631_v33, %v5659_v57 }
 0x150   : > { %v2306_v5 = vrot.slane %v2299_v12, %v4471_v7  ;;  %v2314_v21 = vrot.slane %v2307_v6, %v4471_v7  ;;  %v2341_v49 = vcombine.low %v1117_v54, %v5607_v29  ;;  %v1942_v0 = vcombine.high %v5643_v27, %v5662_v36  ;;  %3057 = vrot.lane.b32.xlu1 %v3775_v22, %s3855_s24  ;;  %v5700_v32 = vpop.permute.xlu1 %2811 }
 0x151   : > { %v1966_v39 = vrot.slane %v1959_v16, %v4471_v7  ;;  %v1974_v43 = vrot.slane %v1967_v17, %v4471_v7  ;;  %v2001_v23 = vcombine.low %v985_v42, %v5622_v30  ;;  %v2340_v63 = vrot.slane %v2333_v52, %v4471_v7  ;;  %2917 = vrot.lane.b32.xlu0 %v3763_v37, %s3855_s24 }
 0x152   : > { %v2000_v38 = vrot.slane %v1993_v28, %v4471_v7  ;;  %v2316_v58 = vcombine.high %v2306_v5, %v2314_v21  ;;  %v2348_v29 = vrot.slane %v2341_v49, %v4471_v7  ;;  %v2315_v13 = vcombine.low %v2306_v5, %v2314_v21  ;;  %v2742_v60 = vpop.permute.xlu0 %2741 }
 0x153   : > { %v1975_v2 = vcombine.low %v1966_v39, %v1974_v43  ;;  %v1976_v3 = vcombine.high %v1966_v39, %v1974_v43  ;;  %v2008_v12 = vrot.slane %v2001_v23, %v4471_v7  ;;  %v2248_v30 = vcombine.high %v5612_v1, %v2246_v45 }
 0x154   : > { %v1907_v22 = vcombine.low %v5625_v61, %v1906_v55  ;;  %v1908_v53 = vcombine.high %v5625_v61, %v1906_v55  ;;  %v2350_v62 = vcombine.high %v2340_v63, %v2348_v29  ;;  %v2247_v50 = vcombine.low %v5612_v1, %v2246_v45  ;;  %v2691_v4 = vpop.permute.xlu1 %2690 }
 0x155   : > { %v1941_v37 = vcombine.low %v5643_v27, %v5662_v36  ;;  %v2009_v16 = vcombine.low %v2000_v38, %v2008_v12  ;;  %v2010_v9 = vcombine.high %v2000_v38, %v2008_v12  ;;  %v5709_v44 = vrot.slane %v2282_v19, %v6369_v41 }
 0x156   : > { %v5712_v7 = vrot.slane %v2350_v62, %v6369_v41  ;;  %v5715_v15 = vrot.slane %v1942_v0, %v6369_v41  ;;  %v5718_v61 = vrot.slane %v2316_v58, %v6369_v41  ;;  %v5724_v27 = vrot.slane %v1976_v3, %v6369_v41  ;;  %v2621_v28 = vpop.permute.xlu0 %2620 }
 0x157   : > { %v5721_v1 = vrot.slane %v2010_v9, %v6369_v41  ;;  %v5727_v36 = vrot.slane %v1975_v2, %v6369_v41  ;;  %v5730_v52 = vrot.slane %v2315_v13, %v6369_v41  ;;  %v5735_v6 = vrot.slane %v1908_v53, %v6369_v41 }
 0x158   : > { %v3715_v54 = vcombine.low %v5709_v44, %v5712_v7  ;;  %v5738_v45 = vrot.slane %v2248_v30, %v6369_v41  ;;  %v5741_v55 = vrot.slane %v1907_v22, %v6369_v41  ;;  %v2349_v42 = vcombine.low %v2340_v63, %v2348_v29  ;;  %v2831_v0 = vpop.permute.xlu1 %2830  ;;  %v6398_v29 = vld [vmem:[#allocation52_spill] sm:$0xff] }
 0x159   : > { %v3691_v17 = vcombine.low %v5715_v15, %v5721_v1  ;;  %v5746_v19 = vrot.slane %v2009_v16, %v6369_v41  ;;  %v5749_v5 = vrot.slane %v2247_v50, %v6369_v41  ;;  %v2281_v21 = vcombine.low %v5631_v33, %v5659_v57  ;;  %v6397_v57 = vld [vmem:[#allocation8_spill] sm:$0xff]  ;;  %v6399_v50 = vld [vmem:[#allocation53_spill] sm:$0xff] }
 0x15a   : > { %3087 = vrot.lane.b32.xlu1 %v3715_v54, %s3853_s22  ;;  %v1949_v49 = vrot.slane %v1941_v37, %v6369_v41  ;;  %v3712_v39 = vcombine.low %v5738_v45, %v5718_v61  ;;  %v3688_v43 = vcombine.low %v5735_v6, %v5724_v27  ;;  %v3676_v23 = vcombine.low %v5741_v55, %v5727_v36  ;;  %v2761_v38 = vpop.permute.xlu0 %2760 }
 0x15b   : > { %2947 = vrot.lane.b32.xlu0 %v3691_v17, %s3853_s22  ;;  %v3700_v33 = vcombine.low %v5749_v5, %v5730_v52  ;;  %v3642_v63 = vcombine.low %v6397_v57, %v6397_v57  ;;  %v3765_v58 = vcombine.high %v5735_v6, %v5724_v27  ;;  %v3630_v13 = vcombine.low %v6398_v29, %v6398_v29 }
 0x15c   : > { %v3679_v2 = vcombine.low %v1949_v49, %v5746_v19  ;;  %v2357_v3 = vrot.slane %v2349_v42, %v6369_v41  ;;  %v2710_v53 = vpop.permute.xlu1 %2709  ;;  %v2289_v62 = vrot.slane %v2281_v21, %v6369_v41  ;;  %v3666_v37 = vcombine.low %v6399_v50, %v6399_v50  ;;  %v6400_v42 = vld [vmem:[#allocation18_spill] sm:$0xff] }
 0x15d   : > { %v3165_v12 = vsel %vm3131_vm6, %v3642_v63, %v5680_v40  ;;  %v3140_v30 = vsel %vm3131_vm6, %v3630_v13, %v5687_v8  ;;  %v3777_v54 = vcombine.high %v5738_v45, %v5718_v61  ;;  %v3654_v8 = vcombine.low %v6400_v42, %v6400_v42 }
 0x15e   : > { %2966 = vrot.lane.b32.xlu1 %v3765_v58, %s3854_s23  ;;  %v3171_v22 = vsel %vm3141_vm7, %v3165_v12, %v2691_v4  ;;  %v3147_v16 = vsel %vm3141_vm7, %v3140_v30, %v2621_v28  ;;  %v2640_v9 = vpop.permute.xlu0 %2639  ;;  %v3703_v17 = vcombine.low %v2289_v62, %v2357_v3  ;;  %v3211_v41 = vsel %vm3131_vm6, %v3666_v37, %v5700_v32 }
 0x15f   : > { %2877 = vrot.lane.b32.xlu0 %v3679_v2, %s3853_s22  ;;  %v3179_v40 = vsel %vm3148_vm8, %v3171_v22, %v2710_v53  ;;  %v3156_v4 = vsel %vm3148_vm8, %v3147_v16, %v2640_v9  ;;  %v3188_v28 = vsel %vm3131_vm6, %v3654_v8, %v2742_v60  ;;  %v3217_v57 = vsel %vm3141_vm7, %v3211_v41, %v2831_v0  ;;  %v6402_v9 = vld [vmem:[#allocation24_spill] sm:$0xff]  ;;  %v6405_v8 = vld [vmem:[#allocation54_spill] sm:$0xff] }
 0x160   : > { %3724 = vmatprep.subr.msk.bf16.mxu0 %vm3329_vm9, %v3179_v40  ;;  %v3330_v21 = vsel %vm3329_vm9, %v3156_v4, 0  ;;  %v3194_v58 = vsel %vm3141_vm7, %v3188_v28, %v2761_v38  ;;  %v3768_v32 = vcombine.high %v5715_v15, %v5721_v1  ;;  %v3759_v60 = vcombine.high %v5741_v55, %v5727_v36 }
 0x161   : > { %3357 = vmatpush1.bf16.msra.mxu0 %v3330_v21  ;;  %v3780_v30 = vcombine.high %v5709_v44, %v5712_v7  ;;  %v3771_v15 = vcombine.high %v5749_v5, %v5730_v52  ;;  %v3774_v53 = vcombine.high %v2289_v62, %v2357_v3  ;;  %v3762_v50 = vcombine.high %v1949_v49, %v5746_v19  ;;  %v3319_v44 = vld [vmem:[%s5980_s2] sm:$0xff]  ;;  %v6404_v62 = vld [vmem:[#allocation40_spill] sm:$0xff] }
 0x162   : > { %3106 = vrot.lane.b32.xlu1 %v3777_v54, %s3854_s23  ;;  %v2850_v63 = vpop.permute.xlu1 %2849  ;;  %v2780_v29 = vpop.permute.xlu0 %2779  ;;  %v6401_v7 = vld [vmem:[#allocation38_spill] sm:$0xff]  ;;  %v6406_v4 = vcombine.low %v6404_v62, %v6405_v8  ;;  %v6416_v8 = vld [vmem:[#allocation9_spill] sm:$0xff] }
 0x163   : > { %3017 = vrot.lane.b32.xlu0 %v3703_v17, %s3853_s22  ;;  %v3225_v13 = vsel %vm3148_vm8, %v3217_v57, %v2850_v63  ;;  %v3202_v2 = vsel %vm3148_vm8, %v3194_v58, %v2780_v29  ;;  %v6403_v40 = vcombine.low %v6401_v7, %v6402_v9  ;;  %v6407_v63 = vld [vmem:[#allocation4_spill] sm:$0xff]  ;;  %v6408_v58 = vld [vmem:[#allocation15_spill] sm:$0xff] }
 0x164   : > { %3726 = vmatprep.subr.msk.bf16.mxu1 %vm3329_vm9, %v3225_v13  ;;  %v3334_v0 = vsel %vm3329_vm9, %v3202_v2, 0  ;;  %v6409_v29 = vcombine.low %v6407_v63, %v6408_v58  ;;  %v6411_v2 = vld [vmem:[#allocation7_spill] sm:$0xff] }
 0x165   : > { %3398 = vmatpush1.bf16.msra.mxu1 %v3334_v0  ;;  %v6419_v58 = vld [vmem:[#allocation11_spill] sm:$0xff] }
 0x166   : > { %2985 = vrot.lane.b32.xlu1 %v3768_v32, %s3855_s24  ;;  %v2810_v38 = vpop.permute.xlu1 %2809  ;;  %v2670_v12 = vpop.permute.xlu0 %2669  ;;  %v6410_v32 = vld [vmem:[#allocation50_spill] sm:$0xff] }
 0x167   : > { %2896 = vrot.lane.b32.xlu0 %v3759_v60, %s3854_s23  ;;  %v3162_v54 = vsel %vm3131_vm6, %v6403_v40, %v2670_v12  ;;  %v3208_v17 = vsel %vm3131_vm6, %v6406_v4, %v2810_v38  ;;  %v6412_v60 = vcombine.low %v6410_v32, %v6411_v2  ;;  %v6413_v40 = vld [vmem:[#allocation45_spill] sm:$0xff]  ;;  %v6417_v4 = vld [vmem:[#allocation2_spill] sm:$0xff] }
 0x168   : > { %v6422_v2 = vld [vmem:[#allocation14_spill] sm:$0xff] }
 0x16a   : > { %3125 = vrot.lane.b32.xlu1 %v3780_v30, %s3855_s24  ;;  %v2689_v1 = vpop.permute.xlu1 %2688  ;;  %v2600_v22 = vpop.permute.xlu0 %2599 }
 0x16b   : > { %3036 = vrot.lane.b32.xlu0 %v3771_v15, %s3854_s23  ;;  %v3169_v42 = vsel %vm3141_vm7, %v3162_v54, %v2689_v1  ;;  %v3137_v0 = vsel %vm3131_vm6, %v6412_v60, %v2600_v22  ;;  %v6414_v22 = vld [vmem:[#allocation44_spill] sm:$0xff]  ;;  %v6423_v60 = vld [vmem:[#allocation3_spill] sm:$0xff] }
 0x16c   : > { %v6415_v54 = vcombine.low %v6413_v40, %v6414_v22 }
 0x16e   : > { %3055 = vrot.lane.b32.xlu1 %v3774_v53, %s3855_s24  ;;  %v2829_v37 = vpop.permute.xlu1 %2828  ;;  %v2740_v16 = vpop.permute.xlu0 %2739 }
 0x16f   : > { %2915 = vrot.lane.b32.xlu0 %v3762_v50, %s3855_s24  ;;  %v3215_v41 = vsel %vm3141_vm7, %v3208_v17, %v2829_v37  ;;  %v3185_v13 = vsel %vm3131_vm6, %v6409_v29, %v2740_v16  ;;  %v6418_v17 = vcombine.low %v6416_v8, %v6417_v4  ;;  %v6420_v29 = vld [vmem:[#allocation10_spill] sm:$0xff] }
 0x172   : > { %v2708_v3 = vpop.permute.xlu1 %2707  ;;  %v2619_v19 = vpop.permute.xlu0 %2618 }
 0x173   : > { %3322 = vperm.xlu0 %3816, %v3319_v44   ;;  %v3176_v49 = vsel %vm3148_vm8, %v3169_v42, %v2708_v3  ;;  %v3145_v30 = vsel %vm3141_vm7, %v3137_v0, %v2619_v19  ;;  %v6424_v0 = vcombine.low %v6422_v2, %v6423_v60 }
 0x174   : > { %3358 = vmatprep.subr.bf16.mxu0 %v3176_v49 }
 0x176   : > { %v2848_v21 = vpop.permute.xlu1 %2847  ;;  %v2759_v28 = vpop.permute.xlu0 %2758 }
 0x177   : > { %v3222_v57 = vsel %vm3148_vm8, %v3215_v41, %v2848_v21  ;;  %v3192_v12 = vsel %vm3141_vm7, %v3185_v13, %v2759_v28  ;;  %v6421_v13 = vcombine.low %v6419_v58, %v6420_v29 }
 0x178   : > { %3399 = vmatprep.subr.bf16.mxu1 %v3222_v57 }
 0x17a   : > { %v2778_v38 = vpop.permute.xlu1 %2777  ;;  %v2638_v15 = vpop.permute.xlu0 %2637 }
 0x17b   : > { %v3199_v1 = vsel %vm3148_vm8, %v3192_v12, %v2778_v38  ;;  %v3153_v53 = vsel %vm3148_vm8, %v3145_v30, %v2638_v15 }
 0x17c   : > { %3400 = vmatpush1.bf16.msra.mxu1 %v3199_v1  ;;  %3359 = vmatpush1.bf16.msra.mxu0 %v3153_v53 }
 0x17e   : > { %v2808_v50 = vpop.permute.xlu1 %2807  ;;  %v2668_v37 = vpop.permute.xlu0 %2667 }
 0x17f   : > { %v3159_v42 = vsel %vm3131_vm6, %v6415_v54, %v2668_v37  ;;  %v3205_v41 = vsel %vm3131_vm6, %v6418_v17, %v2808_v50  ;;  %v5871_v37 = vld [vmem:[%s5979_s1] sm:$0xf] }
 0x182   : > { %v2687_v16 = vpop.permute.xlu1 %2686  ;;  %v2598_v44 = vpop.permute.xlu0 %2597 }
 0x183   : > { %v3167_v3 = vsel %vm3141_vm7, %v3159_v42, %v2687_v16  ;;  %v3134_v12 = vsel %vm3131_vm6, %v6424_v0, %v2598_v44  ;;  %v3690_v42 = vcombine.low %v5282_v20, %v5282_v20  ;;  %v3702_v20 = vcombine.low %v5308_v59, %v5308_v59 }
 0x186   : > { %v2827_v7 = vpop.permute.xlu1 %2826  ;;  %v2738_v9 = vpop.permute.xlu0 %2737 }
 0x187   : > { %v3213_v21 = vsel %vm3141_vm7, %v3205_v41, %v2827_v7  ;;  %v3182_v32 = vsel %vm3131_vm6, %v6421_v13, %v2738_v9 }
 0x18a   : > { %v2706_v19 = vpop.permute.xlu1 %2705  ;;  %v2617_v49 = vpop.permute.xlu0 %2616 }
 0x18b   : > { %v3173_v62 = vsel %vm3148_vm8, %v3167_v3, %v2706_v19  ;;  %v3143_v15 = vsel %vm3141_vm7, %v3134_v12, %v2617_v49  ;;  %v3678_v19 = vcombine.low %v5290_v25, %v5290_v25 }
 0x18c   : > { %3360 = vmatprep.subr.bf16.mxu0 %v3173_v62 }
 0x18e   : > { %v2846_v28 = vpop.permute.xlu1 %2845  ;;  %v2757_v57 = vpop.permute.xlu0 %2756 }
 0x18f   : > { %v3219_v63 = vsel %vm3148_vm8, %v3213_v21, %v2846_v28  ;;  %v3190_v38 = vsel %vm3141_vm7, %v3182_v32, %v2757_v57 }
 0x190   : > { %3401 = vmatprep.subr.bf16.mxu1 %v3219_v63 }
 0x192   : > { %v2776_v30 = vpop.permute.xlu1 %2775  ;;  %v2636_v1 = vpop.permute.xlu0 %2635 }
 0x193   : > { %v3196_v53 = vsel %vm3148_vm8, %v3190_v38, %v2776_v30  ;;  %v3150_v50 = vsel %vm3148_vm8, %v3143_v15, %v2636_v1 }
 0x194   : > { %3402 = vmatpush1.bf16.msra.mxu1 %v3196_v53  ;;  %3361 = vmatpush1.bf16.msra.mxu0 %v3150_v50 }
 0x196   : > { %v2952_v16 = vpop.permute.xlu1 %2951  ;;  %v2882_v44 = vpop.permute.xlu0 %2881 }
 0x197   : > { %3727 = vmatmul.mubr.msk.bf16.vlgmr.msra.gmra.mxu1 %vm3325_vm10, %v5871_v37  ;;  %3725 = vmatmul.mubr.msk.bf16.vlgmr.msra.gmra.mxu0 %vm3325_vm10, %v5871_v37  ;;  %v3257_v49 = vsel %vm3131_vm6, %v3690_v42, %v2952_v16  ;;  %v3234_v62 = vsel %vm3131_vm6, %v3678_v19, %v2882_v44 }
 0x198   : > { %3501 = vmatprep.mubr.bf16.mxu1 %v3856_v11  ;;  %3460 = vmatprep.mubr.bf16.mxu0 %v3856_v11  ;;  %v3714_v11 = vcombine.low %v5305_v48, %v5305_v48 }
 0x19a   : > { %v3092_v7 = vpop.permute.xlu1 %3091  ;;  %v3022_v9 = vpop.permute.xlu0 %3021 }
 0x19b   : > { %v3303_v28 = vsel %vm3131_vm6, %v3714_v11, %v3092_v7  ;;  %v3280_v63 = vsel %vm3131_vm6, %v3702_v20, %v3022_v9 }
 0x19e   : > { %v2971_v40 = vpop.permute.xlu1 %2970  ;;  %v2901_v22 = vpop.permute.xlu0 %2900 }
 0x19f   : > { %v3263_v8 = vsel %vm3141_vm7, %v3257_v49, %v2971_v40  ;;  %v3240_v17 = vsel %vm3141_vm7, %v3234_v62, %v2901_v22 }
 0x1a2   : > { %v3111_v54 = vpop.permute.xlu1 %3110 }
 0x1a3   : > { %v3041_v3 = vpop.permute.xlu0 %3040  ;;  %v3309_v48 = vsel %vm3141_vm7, %v3303_v28, %v3111_v54 }
 0x1a4   : > { %v3286_v29 = vsel %vm3141_vm7, %v3280_v63, %v3041_v3 }
 0x1a6   : > { %v2990_v4 = vpop.permute.xlu1 %2989 }
 0x1a7   : > { %v3271_v41 = vsel %vm3148_vm8, %v3263_v8, %v2990_v4  ;;  %v2920_v21 = vpop.permute.xlu0 %2919 }
 0x1a8   : > { %v3248_v25 = vsel %vm3148_vm8, %v3240_v17, %v2920_v21  ;;  %3728 = vmatprep.subr.msk.bf16.mxu0 %vm3329_vm9, %v3271_v41 }
 0x1a9   : > { %v3338_v57 = vsel %vm3329_vm9, %v3248_v25, 0 }
 0x1aa   : > { %3439 = vmatpush1.bf16.msra.mxu0 %v3338_v57  ;;  %v3130_v58 = vpop.permute.xlu1 %3129 }
 0x1ab   : > { %v3317_v13 = vsel %vm3148_vm8, %v3309_v48, %v3130_v58  ;;  %v3060_v32 = vpop.permute.xlu0 %3059 }
 0x1ac   : > { %v3294_v59 = vsel %vm3148_vm8, %v3286_v29, %v3060_v32  ;;  %3730 = vmatprep.subr.msk.bf16.mxu1 %vm3329_vm9, %v3317_v13 }
 0x1ad   : > { %v3342_v2 = vsel %vm3329_vm9, %v3294_v59, 0 }
 0x1ae   : > { %3480 = vmatpush1.bf16.msra.mxu1 %v3342_v2  ;;  %v3090_v60 = vpop.permute.xlu1 %3089 }
 0x1af   : > { %v2950_v0 = vpop.permute.xlu0 %2949  ;;  %v3300_v7 = vsel %vm3131_vm6, %v3713_v56, %v3090_v60 }
 0x1b0   : > { %v3254_v1 = vsel %vm3131_vm6, %v3689_v24, %v2950_v0 }
 0x1b2   : > { %v2969_v12 = vpop.permute.xlu1 %2968 }
 0x1b3   : > { %v2880_v38 = vpop.permute.xlu0 %2879  ;;  %v3261_v53 = vsel %vm3141_vm7, %v3254_v1, %v2969_v12 }
 0x1b4   : > { %v3231_v24 = vsel %vm3131_vm6, %v3677_v47, %v2880_v38 }
 0x1b6   : > { %v3109_v30 = vpop.permute.xlu1 %3108 }
 0x1b7   : > { %v3020_v15 = vpop.permute.xlu0 %3019  ;;  %v3307_v9 = vsel %vm3141_vm7, %v3300_v7, %v3109_v30 }
 0x1b8   : > { %v3277_v35 = vsel %vm3131_vm6, %v3701_v51, %v3020_v15 }
 0x1ba   : > { %v2988_v50 = vpop.permute.xlu1 %2987 }
 0x1bb   : > { %v2899_v16 = vpop.permute.xlu0 %2898  ;;  %v3268_v44 = vsel %vm3148_vm8, %v3261_v53, %v2988_v50 }
 0x1bc   : > { %3440 = vmatprep.subr.bf16.mxu0 %v3268_v44  ;;  %v3238_v56 = vsel %vm3141_vm7, %v3231_v24, %v2899_v16 }
 0x1be   : > { %v3128_v40 = vpop.permute.xlu1 %3127 }
 0x1bf   : > { %v3039_v22 = vpop.permute.xlu0 %3038  ;;  %v3314_v18 = vsel %vm3148_vm8, %v3307_v9, %v3128_v40 }
 0x1c0   : > { %3481 = vmatprep.subr.bf16.mxu1 %v3314_v18  ;;  %v3284_v31 = vsel %vm3141_vm7, %v3277_v35, %v3039_v22 }
 0x1c2   : > { %v3058_v34 = vpop.permute.xlu1 %3057 }
 0x1c3   : > { %v3291_v54 = vsel %vm3148_vm8, %v3284_v31, %v3058_v34  ;;  %v2918_v42 = vpop.permute.xlu0 %2917 }
 0x1c4   : > { %v3245_v3 = vsel %vm3148_vm8, %v3238_v56, %v2918_v42  ;;  %3482 = vmatpush1.bf16.msra.mxu1 %v3291_v54 }
 0x1c5   : > { %3441 = vmatpush1.bf16.msra.mxu0 %v3245_v3 }
 0x1cc   : > { %v3088_v14 = vpop.permute.xlu1 %3087 }
 0x1cd   : > { %v2948_v10 = vpop.permute.xlu0 %2947  ;;  %v3297_v11 = vsel %vm3131_vm6, %v3712_v39, %v3088_v14 }
 0x1ce   : > { %v3251_v46 = vsel %vm3131_vm6, %v3688_v43, %v2948_v10 }
 0x1d0   : > { %v2967_v51 = vpop.permute.xlu1 %2966 }
 0x1d1   : > { %v2878_v19 = vpop.permute.xlu0 %2877  ;;  %v3259_v47 = vsel %vm3141_vm7, %v3251_v46, %v2967_v51 }
 0x1d2   : > { %v3228_v61 = vsel %vm3131_vm6, %v3676_v23, %v2878_v19 }
 0x1d4   : > { %v3107_v49 = vpop.permute.xlu1 %3106 }
 0x1d5   : > { %v3018_v26 = vpop.permute.xlu0 %3017  ;;  %v3305_v17 = vsel %vm3141_vm7, %v3297_v11, %v3107_v49 }
 0x1d6   : > { %v3274_v6 = vsel %vm3131_vm6, %v3700_v33, %v3018_v26 }
 0x1d8   : > { %v2986_v62 = vpop.permute.xlu1 %2985 }
 0x1d9   : > { %v2897_v8 = vpop.permute.xlu0 %2896  ;;  %v3265_v4 = vsel %vm3148_vm8, %v3259_v47, %v2986_v62 }
 0x1da   : > { %3442 = vmatprep.subr.bf16.mxu0 %v3265_v4  ;;  %v3236_v43 = vsel %vm3141_vm7, %v3228_v61, %v2897_v8 }
 0x1dc   : > { %v3126_v41 = vpop.permute.xlu1 %3125 }
 0x1dd   : > { %v3037_v21 = vpop.permute.xlu0 %3036  ;;  %v3311_v27 = vsel %vm3148_vm8, %v3305_v17, %v3126_v41 }
 0x1de   : > { %3483 = vmatprep.subr.bf16.mxu1 %v3311_v27  ;;  %v3282_v45 = vsel %vm3141_vm7, %v3274_v6, %v3037_v21 }
 0x1e0   : > { %v3056_v39 = vpop.permute.xlu1 %3055 }
 0x1e1   : > { %v3288_v20 = vsel %vm3148_vm8, %v3282_v45, %v3056_v39  ;;  %v2916_v25 = vpop.permute.xlu0 %2915 }
 0x1e2   : > { %v3242_v28 = vsel %vm3148_vm8, %v3236_v43, %v2916_v25  ;;  %3484 = vmatpush1.bf16.msra.mxu1 %v3288_v20 }
 0x1e3   : > { %3443 = vmatpush1.bf16.msra.mxu0 %v3242_v28 }
 0x1e5   : > { %3731 = vmatmul.mubr.msk.bf16.vlgmr.msra.gmra.mxu1 %vm3325_vm10, %v5871_v37 }
 0x1e6   : > { %3729 = vmatmul.mubr.msk.bf16.vlgmr.msra.gmra.mxu0 %vm3325_vm10, %v5871_v37 }
 0x1ee   : > { %v3323_v36 = vpop.permute.xlu0 %3322 }
 0x257   : > { %v3421_v52 = vpop.f32.mrf.mxu1  ;;  %v3380_v55 = vpop.f32.mrf.mxu0 }
 0x258   : > { %v3422_v5 = vadd.f32 %v3421_v52, %v3323_v36  ;;  %v3381_v33 = vadd.f32 %v3380_v55, %v3323_v36 }
 0x259   : > { %v3423_v23 = vpop.f32.mrf.mxu1  ;;  %v3382_v57 = vpop.f32.mrf.mxu0 }
 0x25a   : > { %v3424_v63 = vadd.f32 %v3423_v23, %v3323_v36  ;;  %v3512_v48 = vmax.f32 %v3422_v5, 0.0  ;;  %v3383_v58 = vadd.f32 %v3382_v57, %v3323_v36  ;;  %v3510_v29 = vmax.f32 %v3381_v33, 0.0 }
 0x25b   : > { %v3425_v37 = vpop.f32.mrf.mxu1  ;;  %v3384_v13 = vpop.f32.mrf.mxu0 }
 0x25c   : > { %v3513_v32 = vmax.f32 %v3424_v63, 0.0  ;;  %3520 = vst [vmem:[%s5959_s5 + $0x10] sm:$0xff] %v3512_v48  ;;  %v3511_v2 = vmax.f32 %v3383_v58, 0.0  ;;  %3518 = vst [vmem:[%s5959_s5] sm:$0xff] %v3510_v29 }
 0x25d   : > { %v3426_v59 = vpop.f32.mrf.mxu1  ;;  %v3385_v60 = vpop.f32.mrf.mxu0 }
 0x25e   : > { %3521 = vst [vmem:[%s5959_s5 + $0x18] sm:$0xff] %v3513_v32  ;;  %3519 = vst [vmem:[%s5959_s5 + $0x8] sm:$0xff] %v3511_v2 }
 0x2a5   : > { %v3503_v0 = vpop.f32.mrf.mxu1 }
 0x2a6   : > { %v3462_v12 = vpop.f32.mrf.mxu0  ;;  %v3504_v38 = vadd.f32 %v3503_v0, %v3323_v36 }
 0x2a7   : > { %v3463_v30 = vadd.f32 %v3462_v12, %v3323_v36  ;;  %v3505_v15 = vpop.f32.mrf.mxu1 }
 0x2a8   : > { %v3516_v1 = vmax.f32 %v3504_v38, 0.0  ;;  %v3464_v53 = vpop.f32.mrf.mxu0  ;;  %v3506_v50 = vadd.f32 %v3505_v15, %v3323_v36 }
 0x2a9   : > { %v3514_v16 = vmax.f32 %v3463_v30, 0.0  ;;  %v3465_v44 = vadd.f32 %v3464_v53, %v3323_v36  ;;  %v3507_v7 = vpop.f32.mrf.mxu1 }
 0x2aa   : > { %3524 = vst [vmem:[%s5959_s5 + $0x30] sm:$0xff] %v3516_v1  ;;  %v3517_v9 = vmax.f32 %v3506_v50, 0.0  ;;  %v3466_v40 = vpop.f32.mrf.mxu0 }
 0x2ab   : > { %3522 = vst [vmem:[%s5959_s5 + $0x20] sm:$0xff] %v3514_v16  ;;  %v3515_v22 = vmax.f32 %v3465_v44, 0.0  ;;  %v3508_v18 = vpop.f32.mrf.mxu1 }
 0x2ac   : > { %3525 = vst [vmem:[%s5959_s5 + $0x38] sm:$0xff] %v3517_v9  ;;  %v3467_v35 = vpop.f32.mrf.mxu0 }
 0x2ad   : > { %3523 = vst [vmem:[%s5959_s5 + $0x28] sm:$0xff] %v3515_v22 }
 0x2ae PF: > { %s13_s14 = sadd.s32 1, %s3847_s14   ;;  %s6425_s12 = smov %s3843_s13 }
 0x2af   : > { %p10_p5 = scmp.ge.s32.totalorder %s13_s14, 4   ;;  %s6426_s13 = smov %s6428_s15 }
 0x2b1   :  { %12 = sbr.rel (!%p10_p5) target bundleno = 2 (0x2), region = 62 }

</bundles_post_ra>
